<compile_context>
chip_gen: v7x
topology: tpu7x:2x2x1
jax: 0.10.0
libtpu: 0.0.40
codegen_flags: <defaults>
</compile_context>

<pallas_src>
import math
import numpy as np
import jax
import jax.numpy as jnp
from jax.experimental import pallas as pl

# keep f32 math exact-ish everywhere (prep-time conv/matmul + reference path)
jax.config.update("jax_default_matmul_precision", "highest")

# ------------------------------------------------------------------ config
P = 4                # node_embedding_dim[0]
B = 16               # node_embedding_dim[1]
PB = P * B           # 64
HIDDEN = 32          # hidden_node_dim
EDGE_DIM = 1         # edge_embedding_dim (see NOTE above)
GRAPH_DIM = 50       # graph_dim
PROP_STEPS = 2
NUM_NODES = 6
NUM_EDGES = 8

# derived conv-stack shapes (torch.nn.Conv2d semantics), only used for sanity checks
SW3 = max(B // 16, 1)
_H1, _W1 = 2 * P + 1, B
_H2, _W2 = _H1 - P + 1, _W1 - (B // 2 + 1) + 1
_H3, _W3 = _H2 - P + 1, (_W2 - B // 4) // SW3 + 1
assert 5 * _H3 * _W3 == 5 * 3 * 5  # Linear(75, hidden) input size in the torch spec


# ------------------------------------------------------------------ the single fused kernel
def _gr_forward_kernel(x_ref, ea_ref,
                       scat_in_ref, scat_out_ref, a_in_ref, a_out_ref,
                       deg_in_ref, deg_out_ref,
                       m_fi_ref, m_fj_ref, m_bi_ref, m_bj_ref,
                       bias_f_ref, bias_b_ref, we_f_ref, we_b_ref,
                       rwg_ref, bg_ref, rwf_ref, bf_ref,
                       o_ref):
    """Whole Graph_Representation forward: PROP_STEPS node-space affine updates
    followed by the fused gated graph readout.  All operands are full VMEM blocks."""
    f32 = jnp.float32
    x = x_ref[...]                                     # [V, P*B]
    ea = ea_ref[...]                                   # [1, E]

    # per-forward constant message term, aggregated per node:  C  [V, P*B]
    in_ea = jnp.sum(scat_in_ref[...] * ea, axis=1, keepdims=True)    # [V,1] sum ea over in-edges
    out_ea = jnp.sum(scat_out_ref[...] * ea, axis=1, keepdims=True)  # [V,1] sum ea over out-edges
    c = (deg_in_ref[...] * bias_f_ref[...]
         + deg_out_ref[...] * bias_b_ref[...]
         + in_ea * we_f_ref[...]
         + out_ea * we_b_ref[...])

    a_in = a_in_ref[...]
    a_out = a_out_ref[...]
    deg_in = deg_in_ref[...]
    deg_out = deg_out_ref[...]
    m_fi = m_fi_ref[...]
    m_fj = m_fj_ref[...]
    m_bi = m_bi_ref[...]
    m_bj = m_bj_ref[...]

    for _ in range(PROP_STEPS):                        # static unroll (2 steps)
        x = (deg_in * jnp.dot(x, m_fi, preferred_element_type=f32)
             + jnp.dot(a_in, jnp.dot(x, m_fj, preferred_element_type=f32),
                       preferred_element_type=f32)
             + deg_out * jnp.dot(x, m_bi, preferred_element_type=f32)
             + jnp.dot(a_out, jnp.dot(x, m_bj, preferred_element_type=f32),
                       preferred_element_type=f32)
             + c)

    # fused graph readout:  h = reduce(x);  out = sum_v sigmoid(h@Wg+bg) * (h@Wf+bf)
    g = jax.nn.sigmoid(jnp.dot(x, rwg_ref[...], preferred_element_type=f32) + bg_ref[...])
    h = jnp.dot(x, rwf_ref[...], preferred_element_type=f32) + bf_ref[...]
    o_ref[...] = jnp.sum(g * h, axis=0, keepdims=True)


# ------------------------------------------------------------------ one-time operator fusion
def _affine_reduce_op(rp, cin):
    """End-to-end affine map of the reduce Sequential for an input of shape [cin, P, B]:
    returns (R [cin*P*B, HIDDEN], r_b [HIDDEN]) with reduce(x) == flat_nchw(x) @ R + r_b."""
    n_in = cin * P * B
    basis = jnp.eye(n_in, dtype=jnp.float32).reshape(n_in, cin, P, B)
    zero = jnp.zeros((1, cin, P, B), jnp.float32)

    def conv_stack(inp, with_bias):
        def conv(h, w, b, pad, stride):
            h = jax.lax.conv_general_dilated(
                h, w.astype(jnp.float32), window_strides=stride, padding=pad,
                dimension_numbers=("NCHW", "OIHW", "NCHW"))
            if with_bias:
                h = h + b.astype(jnp.float32)[None, :, None, None]
            return h
        h = conv(inp, rp["c1w"], rp["c1b"], ((P, P), (0, 0)), (1, 1))
        h = conv(h, rp["c2w"], rp["c2b"], ((0, 0), (0, 0)), (1, 1))
        h = conv(h, rp["c3w"], rp["c3b"], ((0, 0), (0, 0)), (1, SW3))
        return h.reshape(h.shape[0], -1)               # NCHW flatten == torch Flatten

    lw = rp["lw"].astype(jnp.float32)
    lb = rp["lb"].astype(jnp.float32)
    r_lin = conv_stack(basis, with_bias=False) @ lw                 # [n_in, HIDDEN]
    r_b = (conv_stack(zero, with_bias=True) @ lw + lb)[0]           # [HIDDEN]
    return r_lin, r_b


def _prep_mpnn(mp):
    """Fold reduce + heads + edge_attr concat of one MPNN direction into dense operators."""
    r, r_b = _affine_reduce_op(mp["reduce"], cin=2)                 # [2*PB, HIDDEN], [HIDDEN]
    w_cat = jnp.concatenate([w for w, _ in mp["node_data"]], axis=1)   # [HIDDEN+EDGE_DIM, PB]
    b_cat = jnp.concatenate([b for _, b in mp["node_data"]], axis=0)   # [PB]
    wh = w_cat[:HIDDEN]                                             # hidden coefficients
    we = w_cat[HIDDEN:HIDDEN + EDGE_DIM]                            # edge_attr coefficient row
    m = r @ wh                                                      # [2*PB, PB]
    bias = (r_b @ wh + b_cat)[None, :]                              # [1, PB]
    return dict(m_i=m[:PB], m_j=m[PB:], bias=bias, we=we)


def prepare_params(params):
    """All weight reshaping / operator fusion, hoisted off the hot path."""
    fwd = _prep_mpnn(params["fwd"])
    bwd = _prep_mpnn(params["bwd"])
    r_g, r_bg = _affine_reduce_op(params["reduce"], cin=1)          # [PB, HIDDEN], [HIDDEN]
    gm_w = params["gm_w"].astype(jnp.float32)
    gm_b = params["gm_b"].astype(jnp.float32)
    fm_w = params["fm_w"].astype(jnp.float32)
    fm_b = params["fm_b"].astype(jnp.float32)
    return dict(
        m_fi=fwd["m_i"], m_fj=fwd["m_j"], bias_f=fwd["bias"], we_f=fwd["we"],
        m_bi=bwd["m_i"], m_bj=bwd["m_j"], bias_b=bwd["bias"], we_b=bwd["we"],
        rwg=r_g @ gm_w, bg=(r_bg @ gm_w + gm_b)[None, :],
        rwf=r_g @ fm_w, bf=(r_bg @ fm_w + fm_b)[None, :])


# ------------------------------------------------------------------ forward builder
def build_forward(edge_index, num_nodes):
    edge_index = np.asarray(edge_index)
    src, dst = edge_index[0].astype(np.int64), edge_index[1].astype(np.int64)
    V, E = int(num_nodes), int(src.shape[0])

    # static edge_index-derived tables (built once)
    scat_in = (np.arange(V)[:, None] == dst[None, :]).astype(np.float32)    # 1{dst[e]==v}
    scat_out = (np.arange(V)[:, None] == src[None, :]).astype(np.float32)   # 1{src[e]==v}
    a_in = scat_in @ scat_out.T       # a_in[v,u]  = #edges u->v  (fwd neighbor counts)
    a_out = a_in.T                    # a_out[v,u] = #edges v->u  (bwd neighbor counts)
    deg_in = scat_in.sum(axis=1, keepdims=True).astype(np.float32)          # [V,1]
    deg_out = scat_out.sum(axis=1, keepdims=True).astype(np.float32)
    consts = [jnp.asarray(a) for a in (scat_in, scat_out, a_in, a_out, deg_in, deg_out)]

    def forward(pp, x, edge_attr):
        xf = x.reshape(V, PB).astype(jnp.float32)
        ea = edge_attr.reshape(1, E).astype(jnp.float32)
        args = [xf, ea, *consts,
                pp["m_fi"], pp["m_fj"], pp["m_bi"], pp["m_bj"],
                pp["bias_f"], pp["bias_b"], pp["we_f"], pp["we_b"],
                pp["rwg"], pp["bg"], pp["rwf"], pp["bf"]]
        out = pl.pallas_call(
            _gr_forward_kernel,
            out_shape=jax.ShapeDtypeStruct((1, GRAPH_DIM), jnp.float32),
            in_specs=[pl.BlockSpec(a.shape, lambda: (0, 0)) for a in args],
            out_specs=pl.BlockSpec((1, GRAPH_DIM), lambda: (0, 0)),
        )(*args)
        return out[0]

    return jax.jit(forward)


# ------------------------------------------------------------------ unfused pure-JAX reference
def _reference_forward(params, x, edge_attr, edge_index):
    """Literal (unfused) re-implementation of the torch module for cross-checking."""
    src = jnp.asarray(np.asarray(edge_index)[0], jnp.int32)
    dst = jnp.asarray(np.asarray(edge_index)[1], jnp.int32)
    V = x.shape[0]

    def reduce_stack(rp, inp):                                   # inp [N, cin, P, B]
        def conv(h, w, b, pad, stride):
            h = jax.lax.conv_general_dilated(
                h, w, window_strides=stride, padding=pad,
                dimension_numbers=("NCHW", "OIHW", "NCHW"))
            return h + b[None, :, None, None]
        h = conv(inp, rp["c1w"], rp["c1b"], ((P, P), (0, 0)), (1, 1))
        h = conv(h, rp["c2w"], rp["c2b"], ((0, 0), (0, 0)), (1, 1))
        h = conv(h, rp["c3w"], rp["c3b"], ((0, 0), (0, 0)), (1, SW3))
        return h.reshape(h.shape[0], -1) @ rp["lw"] + rp["lb"]   # [N, HIDDEN]

    def mpnn(mp, xin, i_idx, j_idx, agg_idx):
        x_i, x_j = xin[i_idx], xin[j_idx]                        # [E, P, B]
        temp = jnp.stack([x_i, x_j], axis=1)                     # [E, 2, P, B]
        hid = reduce_stack(mp["reduce"], temp)                   # [E, HIDDEN]
        feat = jnp.concatenate([hid, edge_attr[:, None].astype(jnp.float32)], axis=1)
        msgs = jnp.stack([feat @ w + b for (w, b) in mp["node_data"]], axis=1)  # [E, P, B]
        return jnp.zeros((V, P, B), jnp.float32).at[agg_idx].add(msgs)

    xc = x.astype(jnp.float32)
    for _ in range(PROP_STEPS):
        # fwd: flow source->target (x_i = x[dst], x_j = x[src], aggregate at dst)
        # bwd: flow target->source (x_i = x[src], x_j = x[dst], aggregate at src)
        xc = mpnn(params["fwd"], xc, dst, src, dst) + mpnn(params["bwd"], xc, src, dst, src)
    h = reduce_stack(params["reduce"], xc[:, None])              # [V, HIDDEN]
    g = jax.nn.sigmoid(h @ params["gm_w"] + params["gm_b"])
    f = h @ params["fm_w"] + params["fm_b"]
    return jnp.sum(g * f, axis=0)


# ------------------------------------------------------------------ deterministic init (torch-layout raw params)
def init_params(key):
    keys = iter(jax.random.split(key, 64))

    def lin(in_d, out_d):
        s = 1.0 / math.sqrt(in_d)
        return (jax.random.uniform(next(keys), (in_d, out_d), jnp.float32, -s, s),
                jax.random.uniform(next(keys), (out_d,), jnp.float32, -s, s))

    def conv(cout, cin, kh, kw):
        s = 1.0 / math.sqrt(cin * kh * kw)
        return (jax.random.uniform(next(keys), (cout, cin, kh, kw), jnp.float32, -s, s),
                jax.random.uniform(next(keys), (cout,), jnp.float32, -s, s))

    def reduce_params(cin):
        c1w, c1b = conv(10, cin, P, 1)
        c2w, c2b = conv(50, 10, P, B // 2 + 1)
        c3w, c3b = conv(5, 50, P, B // 4)
        lw, lb = lin(5 * 3 * 5, HIDDEN)
        return dict(c1w=c1w, c1b=c1b, c2w=c2w, c2b=c2b, c3w=c3w, c3b=c3b, lw=lw, lb=lb)

    def mpnn_params():
        return dict(reduce=reduce_params(2),
                    node_data=[lin(HIDDEN + EDGE_DIM, B) for _ in range(P)])

    gm_w, gm_b = lin(HIDDEN, GRAPH_DIM)
    fm_w, fm_b = lin(HIDDEN, GRAPH_DIM)
    return dict(fwd=mpnn_params(), bwd=mpnn_params(), reduce=reduce_params(1),
                gm_w=gm_w, gm_b=gm_b, fm_w=fm_w, fm_b=fm_b)


# ------------------------------------------------------------------ main
if __name__ == "__main__":
    key = jax.random.PRNGKey(0)
    k_param, k_x, k_e = jax.random.split(key, 3)

    params = init_params(k_param)
    prepped = prepare_params(params)   # all operator fusion done once, off the hot path

    x = jax.random.normal(k_x, (NUM_NODES, P, B), jnp.float32)      # node embeddings [V, p, b]
    edge_attr = jax.random.normal(k_e, (NUM_EDGES,), jnp.float32)   # 1-D edge attrs
    edge_index = np.array(
        [[0, 1, 2, 3, 4, 5, 0, 2],
         [1, 2, 3, 4, 5, 0, 3, 5]], dtype=np.int32)                 # [2, E]

    forward = build_forward(edge_index, NUM_NODES)
    h_G = jax.block_until_ready(forward(prepped, x, edge_attr))

    assert h_G.shape == (GRAPH_DIM,)
    assert bool(jnp.all(jnp.isfinite(h_G)))

    # cross-check the fused single-kernel path against the unfused reference
    ref = jax.block_until_ready(_reference_forward(params, x, edge_attr, edge_index))
    np.testing.assert_allclose(np.asarray(h_G), np.asarray(ref), rtol=1e-3, atol=1e-3)

    print("KERNEL_OK")
</pallas_src>

<mosaic_0001>
module attributes {stable_mosaic.version = 11 : i64} {
  func.func @_gr_forward_kernel(%arg0: memref<6x64xf32, #tpu.memory_space<vmem>>, %arg1: memref<1x8xf32, #tpu.memory_space<vmem>>, %arg2: memref<6x8xf32, #tpu.memory_space<vmem>>, %arg3: memref<6x8xf32, #tpu.memory_space<vmem>>, %arg4: memref<6x6xf32, #tpu.memory_space<vmem>>, %arg5: memref<6x6xf32, #tpu.memory_space<vmem>>, %arg6: memref<6x1xf32, #tpu.memory_space<vmem>>, %arg7: memref<6x1xf32, #tpu.memory_space<vmem>>, %arg8: memref<64x64xf32, #tpu.memory_space<vmem>>, %arg9: memref<64x64xf32, #tpu.memory_space<vmem>>, %arg10: memref<64x64xf32, #tpu.memory_space<vmem>>, %arg11: memref<64x64xf32, #tpu.memory_space<vmem>>, %arg12: memref<1x64xf32, #tpu.memory_space<vmem>>, %arg13: memref<1x64xf32, #tpu.memory_space<vmem>>, %arg14: memref<1x64xf32, #tpu.memory_space<vmem>>, %arg15: memref<1x64xf32, #tpu.memory_space<vmem>>, %arg16: memref<64x50xf32, #tpu.memory_space<vmem>>, %arg17: memref<1x50xf32, #tpu.memory_space<vmem>>, %arg18: memref<64x50xf32, #tpu.memory_space<vmem>>, %arg19: memref<1x50xf32, #tpu.memory_space<vmem>>, %arg20: memref<1x50xf32, #tpu.memory_space<vmem>>) attributes {dimension_semantics = [], scalar_prefetch = 0 : i64, scratch_operands = 0 : i64, tpu.core_type = #tpu.core_type<tc>} {
    %c0 = arith.constant 0 : index
    %c0_0 = arith.constant 0 : index
    %0 = vector.load %arg0[%c0, %c0_0] : memref<6x64xf32, #tpu.memory_space<vmem>>, vector<6x64xf32>
    %c0_1 = arith.constant 0 : index
    %c0_2 = arith.constant 0 : index
    %1 = vector.load %arg1[%c0_1, %c0_2] : memref<1x8xf32, #tpu.memory_space<vmem>>, vector<1x8xf32>
    %c0_3 = arith.constant 0 : index
    %c0_4 = arith.constant 0 : index
    %2 = vector.load %arg2[%c0_3, %c0_4] : memref<6x8xf32, #tpu.memory_space<vmem>>, vector<6x8xf32>
    %3 = vector.broadcast %1 : vector<1x8xf32> to vector<6x8xf32>
    %4 = arith.mulf %2, %3 : vector<6x8xf32>
    %cst = arith.constant dense<0.000000e+00> : vector<6xf32>
    %5 = vector.multi_reduction <add>, %4, %cst [1] : vector<6x8xf32> to vector<6xf32>
    %6 = vector.shape_cast %5 : vector<6xf32> to vector<6x1xf32>
    %c0_5 = arith.constant 0 : index
    %c0_6 = arith.constant 0 : index
    %7 = vector.load %arg3[%c0_5, %c0_6] : memref<6x8xf32, #tpu.memory_space<vmem>>, vector<6x8xf32>
    %8 = vector.broadcast %1 : vector<1x8xf32> to vector<6x8xf32>
    %9 = arith.mulf %7, %8 : vector<6x8xf32>
    %cst_7 = arith.constant dense<0.000000e+00> : vector<6xf32>
    %10 = vector.multi_reduction <add>, %9, %cst_7 [1] : vector<6x8xf32> to vector<6xf32>
    %11 = vector.shape_cast %10 : vector<6xf32> to vector<6x1xf32>
    %c0_8 = arith.constant 0 : index
    %c0_9 = arith.constant 0 : index
    %12 = vector.load %arg6[%c0_8, %c0_9] : memref<6x1xf32, #tpu.memory_space<vmem>>, vector<6x1xf32>
    %c0_10 = arith.constant 0 : index
    %c0_11 = arith.constant 0 : index
    %13 = vector.load %arg12[%c0_10, %c0_11] : memref<1x64xf32, #tpu.memory_space<vmem>>, vector<1x64xf32>
    %14 = vector.broadcast %12 : vector<6x1xf32> to vector<6x64xf32>
    %15 = vector.broadcast %13 : vector<1x64xf32> to vector<6x64xf32>
    %16 = arith.mulf %14, %15 : vector<6x64xf32>
    %c0_12 = arith.constant 0 : index
    %c0_13 = arith.constant 0 : index
    %17 = vector.load %arg7[%c0_12, %c0_13] : memref<6x1xf32, #tpu.memory_space<vmem>>, vector<6x1xf32>
    %c0_14 = arith.constant 0 : index
    %c0_15 = arith.constant 0 : index
    %18 = vector.load %arg13[%c0_14, %c0_15] : memref<1x64xf32, #tpu.memory_space<vmem>>, vector<1x64xf32>
    %19 = vector.broadcast %17 : vector<6x1xf32> to vector<6x64xf32>
    %20 = vector.broadcast %18 : vector<1x64xf32> to vector<6x64xf32>
    %21 = arith.mulf %19, %20 : vector<6x64xf32>
    %22 = arith.addf %16, %21 : vector<6x64xf32>
    %c0_16 = arith.constant 0 : index
    %c0_17 = arith.constant 0 : index
    %23 = vector.load %arg14[%c0_16, %c0_17] : memref<1x64xf32, #tpu.memory_space<vmem>>, vector<1x64xf32>
    %24 = vector.broadcast %6 : vector<6x1xf32> to vector<6x64xf32>
    %25 = vector.broadcast %23 : vector<1x64xf32> to vector<6x64xf32>
    %26 = arith.mulf %24, %25 : vector<6x64xf32>
    %27 = arith.addf %22, %26 : vector<6x64xf32>
    %c0_18 = arith.constant 0 : index
    %c0_19 = arith.constant 0 : index
    %28 = vector.load %arg15[%c0_18, %c0_19] : memref<1x64xf32, #tpu.memory_space<vmem>>, vector<1x64xf32>
    %29 = vector.broadcast %11 : vector<6x1xf32> to vector<6x64xf32>
    %30 = vector.broadcast %28 : vector<1x64xf32> to vector<6x64xf32>
    %31 = arith.mulf %29, %30 : vector<6x64xf32>
    %32 = arith.addf %27, %31 : vector<6x64xf32>
    %c0_20 = arith.constant 0 : index
    %c0_21 = arith.constant 0 : index
    %33 = vector.load %arg4[%c0_20, %c0_21] : memref<6x6xf32, #tpu.memory_space<vmem>>, vector<6x6xf32>
    %c0_22 = arith.constant 0 : index
    %c0_23 = arith.constant 0 : index
    %34 = vector.load %arg5[%c0_22, %c0_23] : memref<6x6xf32, #tpu.memory_space<vmem>>, vector<6x6xf32>
    %c0_24 = arith.constant 0 : index
    %c0_25 = arith.constant 0 : index
    %35 = vector.load %arg6[%c0_24, %c0_25] : memref<6x1xf32, #tpu.memory_space<vmem>>, vector<6x1xf32>
    %c0_26 = arith.constant 0 : index
    %c0_27 = arith.constant 0 : index
    %36 = vector.load %arg7[%c0_26, %c0_27] : memref<6x1xf32, #tpu.memory_space<vmem>>, vector<6x1xf32>
    %c0_28 = arith.constant 0 : index
    %c0_29 = arith.constant 0 : index
    %37 = vector.load %arg8[%c0_28, %c0_29] : memref<64x64xf32, #tpu.memory_space<vmem>>, vector<64x64xf32>
    %c0_30 = arith.constant 0 : index
    %c0_31 = arith.constant 0 : index
    %38 = vector.load %arg9[%c0_30, %c0_31] : memref<64x64xf32, #tpu.memory_space<vmem>>, vector<64x64xf32>
    %c0_32 = arith.constant 0 : index
    %c0_33 = arith.constant 0 : index
    %39 = vector.load %arg10[%c0_32, %c0_33] : memref<64x64xf32, #tpu.memory_space<vmem>>, vector<64x64xf32>
    %c0_34 = arith.constant 0 : index
    %c0_35 = arith.constant 0 : index
    %40 = vector.load %arg11[%c0_34, %c0_35] : memref<64x64xf32, #tpu.memory_space<vmem>>, vector<64x64xf32>
    %cst_36 = arith.constant dense<0.000000e+00> : vector<6x64xf32>
    %41 = tpu.matmul %0, %37, %cst_36 {dimension_numbers = #tpu.dot_dimension_numbers<[1], [0], [0], [1], [0, 0, 1, 1], [], []>, precision = #tpu.contract_precision<fp32>} : vector<6x64xf32>, vector<64x64xf32>, vector<6x64xf32> -> vector<6x64xf32>
    %42 = vector.broadcast %35 : vector<6x1xf32> to vector<6x64xf32>
    %43 = arith.mulf %42, %41 : vector<6x64xf32>
    %cst_37 = arith.constant dense<0.000000e+00> : vector<6x64xf32>
    %44 = tpu.matmul %0, %38, %cst_37 {dimension_numbers = #tpu.dot_dimension_numbers<[1], [0], [0], [1], [0, 0, 1, 1], [], []>, precision = #tpu.contract_precision<fp32>} : vector<6x64xf32>, vector<64x64xf32>, vector<6x64xf32> -> vector<6x64xf32>
    %cst_38 = arith.constant dense<0.000000e+00> : vector<6x64xf32>
    %45 = tpu.matmul %33, %44, %cst_38 {dimension_numbers = #tpu.dot_dimension_numbers<[1], [0], [0], [1], [0, 0, 1, 1], [], []>, precision = #tpu.contract_precision<fp32>} : vector<6x6xf32>, vector<6x64xf32>, vector<6x64xf32> -> vector<6x64xf32>
    %46 = arith.addf %43, %45 : vector<6x64xf32>
    %cst_39 = arith.constant dense<0.000000e+00> : vector<6x64xf32>
    %47 = tpu.matmul %0, %39, %cst_39 {dimension_numbers = #tpu.dot_dimension_numbers<[1], [0], [0], [1], [0, 0, 1, 1], [], []>, precision = #tpu.contract_precision<fp32>} : vector<6x64xf32>, vector<64x64xf32>, vector<6x64xf32> -> vector<6x64xf32>
    %48 = vector.broadcast %36 : vector<6x1xf32> to vector<6x64xf32>
    %49 = arith.mulf %48, %47 : vector<6x64xf32>
    %50 = arith.addf %46, %49 : vector<6x64xf32>
    %cst_40 = arith.constant dense<0.000000e+00> : vector<6x64xf32>
    %51 = tpu.matmul %0, %40, %cst_40 {dimension_numbers = #tpu.dot_dimension_numbers<[1], [0], [0], [1], [0, 0, 1, 1], [], []>, precision = #tpu.contract_precision<fp32>} : vector<6x64xf32>, vector<64x64xf32>, vector<6x64xf32> -> vector<6x64xf32>
    %cst_41 = arith.constant dense<0.000000e+00> : vector<6x64xf32>
    %52 = tpu.matmul %34, %51, %cst_41 {dimension_numbers = #tpu.dot_dimension_numbers<[1], [0], [0], [1], [0, 0, 1, 1], [], []>, precision = #tpu.contract_precision<fp32>} : vector<6x6xf32>, vector<6x64xf32>, vector<6x64xf32> -> vector<6x64xf32>
    %53 = arith.addf %50, %52 : vector<6x64xf32>
    %54 = arith.addf %53, %32 : vector<6x64xf32>
    %cst_42 = arith.constant dense<0.000000e+00> : vector<6x64xf32>
    %55 = tpu.matmul %54, %37, %cst_42 {dimension_numbers = #tpu.dot_dimension_numbers<[1], [0], [0], [1], [0, 0, 1, 1], [], []>, precision = #tpu.contract_precision<fp32>} : vector<6x64xf32>, vector<64x64xf32>, vector<6x64xf32> -> vector<6x64xf32>
    %56 = vector.broadcast %35 : vector<6x1xf32> to vector<6x64xf32>
    %57 = arith.mulf %56, %55 : vector<6x64xf32>
    %cst_43 = arith.constant dense<0.000000e+00> : vector<6x64xf32>
    %58 = tpu.matmul %54, %38, %cst_43 {dimension_numbers = #tpu.dot_dimension_numbers<[1], [0], [0], [1], [0, 0, 1, 1], [], []>, precision = #tpu.contract_precision<fp32>} : vector<6x64xf32>, vector<64x64xf32>, vector<6x64xf32> -> vector<6x64xf32>
    %cst_44 = arith.constant dense<0.000000e+00> : vector<6x64xf32>
    %59 = tpu.matmul %33, %58, %cst_44 {dimension_numbers = #tpu.dot_dimension_numbers<[1], [0], [0], [1], [0, 0, 1, 1], [], []>, precision = #tpu.contract_precision<fp32>} : vector<6x6xf32>, vector<6x64xf32>, vector<6x64xf32> -> vector<6x64xf32>
    %60 = arith.addf %57, %59 : vector<6x64xf32>
    %cst_45 = arith.constant dense<0.000000e+00> : vector<6x64xf32>
    %61 = tpu.matmul %54, %39, %cst_45 {dimension_numbers = #tpu.dot_dimension_numbers<[1], [0], [0], [1], [0, 0, 1, 1], [], []>, precision = #tpu.contract_precision<fp32>} : vector<6x64xf32>, vector<64x64xf32>, vector<6x64xf32> -> vector<6x64xf32>
    %62 = vector.broadcast %36 : vector<6x1xf32> to vector<6x64xf32>
    %63 = arith.mulf %62, %61 : vector<6x64xf32>
    %64 = arith.addf %60, %63 : vector<6x64xf32>
    %cst_46 = arith.constant dense<0.000000e+00> : vector<6x64xf32>
    %65 = tpu.matmul %54, %40, %cst_46 {dimension_numbers = #tpu.dot_dimension_numbers<[1], [0], [0], [1], [0, 0, 1, 1], [], []>, precision = #tpu.contract_precision<fp32>} : vector<6x64xf32>, vector<64x64xf32>, vector<6x64xf32> -> vector<6x64xf32>
    %cst_47 = arith.constant dense<0.000000e+00> : vector<6x64xf32>
    %66 = tpu.matmul %34, %65, %cst_47 {dimension_numbers = #tpu.dot_dimension_numbers<[1], [0], [0], [1], [0, 0, 1, 1], [], []>, precision = #tpu.contract_precision<fp32>} : vector<6x6xf32>, vector<6x64xf32>, vector<6x64xf32> -> vector<6x64xf32>
    %67 = arith.addf %64, %66 : vector<6x64xf32>
    %68 = arith.addf %67, %32 : vector<6x64xf32>
    %c0_48 = arith.constant 0 : index
    %c0_49 = arith.constant 0 : index
    %69 = vector.load %arg16[%c0_48, %c0_49] : memref<64x50xf32, #tpu.memory_space<vmem>>, vector<64x50xf32>
    %cst_50 = arith.constant dense<0.000000e+00> : vector<6x50xf32>
    %70 = tpu.matmul %68, %69, %cst_50 {dimension_numbers = #tpu.dot_dimension_numbers<[1], [0], [0], [1], [0, 0, 1, 1], [], []>, precision = #tpu.contract_precision<fp32>} : vector<6x64xf32>, vector<64x50xf32>, vector<6x50xf32> -> vector<6x50xf32>
    %c0_51 = arith.constant 0 : index
    %c0_52 = arith.constant 0 : index
    %71 = vector.load %arg17[%c0_51, %c0_52] : memref<1x50xf32, #tpu.memory_space<vmem>>, vector<1x50xf32>
    %72 = vector.broadcast %71 : vector<1x50xf32> to vector<6x50xf32>
    %73 = arith.addf %70, %72 : vector<6x50xf32>
    %74 = arith.negf %73 : vector<6x50xf32>
    %75 = math.exp %74 : vector<6x50xf32>
    %cst_53 = arith.constant 1.000000e+00 : f32
    %76 = vector.broadcast %cst_53 : f32 to vector<6x50xf32>
    %77 = arith.addf %76, %75 : vector<6x50xf32>
    %78 = arith.divf %76, %77 : vector<6x50xf32>
    %c0_54 = arith.constant 0 : index
    %c0_55 = arith.constant 0 : index
    %79 = vector.load %arg18[%c0_54, %c0_55] : memref<64x50xf32, #tpu.memory_space<vmem>>, vector<64x50xf32>
    %cst_56 = arith.constant dense<0.000000e+00> : vector<6x50xf32>
    %80 = tpu.matmul %68, %79, %cst_56 {dimension_numbers = #tpu.dot_dimension_numbers<[1], [0], [0], [1], [0, 0, 1, 1], [], []>, precision = #tpu.contract_precision<fp32>} : vector<6x64xf32>, vector<64x50xf32>, vector<6x50xf32> -> vector<6x50xf32>
    %c0_57 = arith.constant 0 : index
    %c0_58 = arith.constant 0 : index
    %81 = vector.load %arg19[%c0_57, %c0_58] : memref<1x50xf32, #tpu.memory_space<vmem>>, vector<1x50xf32>
    %82 = vector.broadcast %81 : vector<1x50xf32> to vector<6x50xf32>
    %83 = arith.addf %80, %82 : vector<6x50xf32>
    %84 = arith.mulf %78, %83 : vector<6x50xf32>
    %cst_59 = arith.constant dense<0.000000e+00> : vector<50xf32>
    %85 = vector.multi_reduction <add>, %84, %cst_59 [0] : vector<6x50xf32> to vector<50xf32>
    %86 = vector.shape_cast %85 : vector<50xf32> to vector<1x50xf32>
    %c0_60 = arith.constant 0 : index
    %c0_61 = arith.constant 0 : index
    %87 = vector.load %arg20[%c0_60, %c0_61] : memref<1x50xf32, #tpu.memory_space<vmem>>, vector<1x50xf32>
    tpu.vector_store %arg20[%c0_60, %c0_61], %86 {strides = array<i32>} : memref<1x50xf32, #tpu.memory_space<vmem>>, vector<1x50xf32>,
    return
  }
}

</mosaic_0001>

<bundles_post_ra>
// kernel: forward.1
= control target key start
LH: loop header
LB: loop body
LE: loop exit
PB: predicated region body
PF: predicated region fallthrough
CT: control target
= control target key end

     0   :  { %s12188_s0 = inlined_call_operand.vmem [shape: f32[6,64], index: 0, kind: input, shape index: {}]   ;;  %s12189_s1 = inlined_call_operand.hbm [shape: f32[1,8], index: 1, kind: input, shape index: {}]   ;;  %s12190_s2 = inlined_call_operand.vmem [shape: f32[6,8], index: 2, kind: input, shape index: {}]   ;;  %s12191_s3 = inlined_call_operand.vmem [shape: f32[6,8], index: 3, kind: input, shape index: {}]   ;;  %s12192_s4 = inlined_call_operand.vmem [shape: f32[6,6], index: 4, kind: input, shape index: {}]   ;;  %s12193_s5 = inlined_call_operand.vmem [shape: f32[6,6], index: 5, kind: input, shape index: {}]   ;;  %s12194_s6 = inlined_call_operand.vmem [shape: f32[6,1], index: 6, kind: input, shape index: {}]   ;;  %s12195_s7 = inlined_call_operand.vmem [shape: f32[6,1], index: 7, kind: input, shape index: {}]   ;;  %s12196_s8 = inlined_call_operand.vmem [shape: f32[64,64], index: 8, kind: input, shape index: {}]   ;;  %s12197_s9 = inlined_call_operand.vmem [shape: f32[64,64], index: 9, kind: input, shape index: {}]   ;;  %s12198_s10 = inlined_call_operand.vmem [shape: f32[64,64], index: 10, kind: input, shape index: {}]   ;;  %s12199_s11 = inlined_call_operand.vmem [shape: f32[64,64], index: 11, kind: input, shape index: {}]   ;;  %s12200_s12 = inlined_call_operand.hbm [shape: f32[1,64], index: 12, kind: input, shape index: {}]   ;;  %s12201_s13 = inlined_call_operand.hbm [shape: f32[1,64], index: 13, kind: input, shape index: {}]   ;;  %s12202_s14 = inlined_call_operand.hbm [shape: f32[1,64], index: 14, kind: input, shape index: {}]   ;;  %s12203_s15 = inlined_call_operand.hbm [shape: f32[1,64], index: 15, kind: input, shape index: {}]   ;;  %s12204_s16 = inlined_call_operand.vmem [shape: f32[64,50], index: 16, kind: input, shape index: {}]   ;;  %s12205_s17 = inlined_call_operand.hbm [shape: f32[1,50], index: 17, kind: input, shape index: {}]   ;;  %s12206_s18 = inlined_call_operand.vmem [shape: f32[64,50], index: 18, kind: input, shape index: {}]   ;;  %s12207_s19 = inlined_call_operand.hbm [shape: f32[1,50], index: 19, kind: input, shape index: {}]   ;;  %s12208_s20 = inlined_call_operand.hbm [shape: f32[1,50], index: 20, kind: output, shape index: {}]  }
   0x1   :  { %12261 = sst [smem:[#allocation59_spill]] %s12188_s0 }
   0x2   :  { %12262 = sst [smem:[#allocation60_spill]] %s12189_s1 }
   0x3   :  { %12263 = sst [smem:[#allocation61_spill]] %s12190_s2 }
   0x4   :  { %12264 = sst [smem:[#allocation62_spill]] %s12191_s3 }
   0x5   :  { %12265 = sst [smem:[#allocation63_spill]] %s12192_s4 }
   0x6   :  { %25 = vsyncpa [#allocation3], 0 }
   0x7   :  { %26 = vsyncpa [#allocation6], 0 }
   0x8   :  { %27 = vsyncpa [#allocation9], 0 }
   0x9   :  { %28 = vsyncpa [#allocation12], 0 }
   0xa   :  { %29 = vsyncpa [#allocation4], 0  ;;  %s10390_s1 = smov [#allocation5]   ;;  %s10391_s23 = smov [#allocation8]  }
   0xb   :  { %s68_s22 = sshll.u32 %s10390_s1, 4  ;;  %s88_s24 = sshll.u32 %s10391_s23, 4  ;;  %s69_s22 = int_to_ptr.vmem [resolvable:$true] %s68_s22  ;;  %s89_s24 = int_to_ptr.vmem [resolvable:$true] %s88_s24 }
   0xc   :  { %s10204_s3 = scalar_lea.hbm %s12200_s12, 16 }
   0xd   :  { %p10205_p0 = scmp.ne.s32.totalorder %s12200_s12, %s10204_s3  ;;  %p10208_p1 = scmp.lt.u32.totalorder %s10204_s3, %s12200_s12 }
   0xf   :  { %p10210_p2 = pnand %p10208_p1, %p10205_p0 }
  0x11   :  { %10213 = shalt.err (!%p10210_p2)
}
  0x12   :  { %s10214_s29 = scalar_lea.vmem %s69_s22, 16  ;;  %s10218_s30 = scalar_lea.vmem %s69_s22, 32 }
  0x13   :  { %p10215_p3 = scmp.ne.s32.totalorder %s69_s22, %s10214_s29  ;;  %p10219_p4 = scmp.lt.s32.totalorder %s69_s22, %s69_s22 }
  0x14   :  { %p10220_p5 = scmp.lt.s32.totalorder %s10218_s30, %s10214_s29 }
  0x16   :  { %p10221_p6 = por %p10220_p5, %p10219_p4 }
  0x18   :  { %p10222_p7 = pnand %p10221_p6, %p10215_p3 }
  0x1a   :  { %10225 = shalt.err (!%p10222_p7)
}
  0x1b   :  { %71 = dma.hbm_to_vmem [thread:$0]  %s12200_s12, 16, %s69_s22, [#allocation6]  }
  0x1c   :  { %s10226_s2 = scalar_lea.hbm %s12202_s14, 16 }
  0x1d   :  { %p10227_p8 = scmp.ne.s32.totalorder %s12202_s14, %s10226_s2  ;;  %p10230_p9 = scmp.lt.u32.totalorder %s10226_s2, %s12202_s14 }
  0x1f   :  { %p10232_p10 = pnand %p10230_p9, %p10227_p8 }
  0x21   :  { %10235 = shalt.err (!%p10232_p10)
}
  0x22   :  { %s10236_s28 = scalar_lea.vmem %s89_s24, 16  ;;  %s10240_s4 = scalar_lea.vmem %s89_s24, 32 }
  0x23   :  { %p10237_p11 = scmp.ne.s32.totalorder %s89_s24, %s10236_s28  ;;  %p10241_p12 = scmp.lt.s32.totalorder %s89_s24, %s89_s24 }
  0x24   :  { %p10242_p13 = scmp.lt.s32.totalorder %s10240_s4, %s10236_s28 }
  0x26   :  { %p10243_p0 = por %p10242_p13, %p10241_p12 }
  0x28   :  { %p10244_p1 = pnand %p10243_p0, %p10237_p11 }
  0x2a   :  { %10247 = shalt.err (!%p10244_p1)
}
  0x2b   :  { %91 = dma.hbm_to_vmem [thread:$0]  %s12202_s14, 16, %s89_s24, [#allocation9]  }
  0x2c   :  { %s10392_s29 = smov [#allocation11]   ;;  %s10393_s0 = smov [#allocation2]  }
  0x2d   :  { %s110_s30 = sshll.u32 %s10392_s29, 4  ;;  %s38_s21 = sshll.u32 %s10393_s0, 4  ;;  %s111_s30 = int_to_ptr.vmem [resolvable:$true] %s110_s30  ;;  %s39_s21 = int_to_ptr.vmem [resolvable:$true] %s38_s21 }
  0x2e   :  { %s10248_s2 = scalar_lea.hbm %s12205_s17, 16 }
  0x2f   :  { %p10249_p2 = scmp.ne.s32.totalorder %s12205_s17, %s10248_s2  ;;  %p10252_p3 = scmp.lt.u32.totalorder %s10248_s2, %s12205_s17 }
  0x31   :  { %p10254_p4 = pnand %p10252_p3, %p10249_p2 }
  0x33   :  { %10257 = shalt.err (!%p10254_p4)
}
  0x34   :  { %s10258_s14 = scalar_lea.vmem %s111_s30, 16  ;;  %s10262_s24 = scalar_lea.vmem %s111_s30, 32 }
  0x35   :  { %p10259_p5 = scmp.ne.s32.totalorder %s111_s30, %s10258_s14  ;;  %p10263_p6 = scmp.lt.s32.totalorder %s111_s30, %s111_s30 }
  0x36   :  { %p10264_p7 = scmp.lt.s32.totalorder %s10262_s24, %s10258_s14 }
  0x38   :  { %p10265_p8 = por %p10264_p7, %p10263_p6 }
  0x3a   :  { %p10266_p9 = pnand %p10265_p8, %p10259_p5 }
  0x3c   :  { %10269 = shalt.err (!%p10266_p9)
}
  0x3d   :  { %113 = dma.hbm_to_vmem [thread:$0]  %s12205_s17, 16, %s111_s30, [#allocation12]  }
  0x3e   :  { %s12266_s29 = sld [smem:[#allocation60_spill]] }
  0x44   :  { %s10270_s0 = scalar_lea.hbm %s12266_s29, 16 }
  0x45   :  { %p10271_p10 = scmp.ne.s32.totalorder %s12266_s29, %s10270_s0  ;;  %p10274_p11 = scmp.lt.u32.totalorder %s10270_s0, %s12266_s29 }
  0x47   :  { %p10276_p12 = pnand %p10274_p11, %p10271_p10 }
  0x49   :  { %10279 = shalt.err (!%p10276_p12)
}
  0x4a   :  { %s10280_s3 = scalar_lea.vmem %s39_s21, 16  ;;  %s10284_s26 = scalar_lea.vmem %s39_s21, 32 }
  0x4b   :  { %p10281_p13 = scmp.ne.s32.totalorder %s39_s21, %s10280_s3  ;;  %p10285_p0 = scmp.lt.s32.totalorder %s39_s21, %s39_s21 }
  0x4c   :  { %p10286_p1 = scmp.lt.s32.totalorder %s10284_s26, %s10280_s3 }
  0x4e   :  { %p10287_p2 = por %p10286_p1, %p10285_p0 }
  0x50   :  { %p10288_p3 = pnand %p10287_p2, %p10281_p13 }
  0x52   :  { %10291 = shalt.err (!%p10288_p3)
}
  0x53   :  { %41 = dma.hbm_to_vmem [thread:$0]  %s12266_s29, 16, %s39_s21, [#allocation3]  }
  0x54   :  { %s10394_s27 = smov [#allocation7]   ;;  %s10395_s24 = smov [#allocation10]  }
  0x55   :  { %s78_s14 = sshll.u32 %s10394_s27, 4  ;;  %s98_s28 = sshll.u32 %s10395_s24, 4  ;;  %s79_s14 = int_to_ptr.vmem [resolvable:$true] %s78_s14  ;;  %s99_s28 = int_to_ptr.vmem [resolvable:$true] %s98_s28 }
  0x56   :  { %s10292_s22 = scalar_lea.hbm %s12201_s13, 16 }
  0x57   :  { %p10293_p4 = scmp.ne.s32.totalorder %s12201_s13, %s10292_s22  ;;  %p10296_p5 = scmp.lt.u32.totalorder %s10292_s22, %s12201_s13 }
  0x59   :  { %p10298_p6 = pnand %p10296_p5, %p10293_p4 }
  0x5b   :  { %10301 = shalt.err (!%p10298_p6)
}
  0x5c   :  { %s10302_s21 = scalar_lea.vmem %s79_s14, 16  ;;  %s10306_s29 = scalar_lea.vmem %s79_s14, 32 }
  0x5d   :  { %p10303_p7 = scmp.ne.s32.totalorder %s79_s14, %s10302_s21  ;;  %p10307_p8 = scmp.lt.s32.totalorder %s79_s14, %s79_s14 }
  0x5e   :  { %p10308_p9 = scmp.lt.s32.totalorder %s10306_s29, %s10302_s21 }
  0x60   :  { %p10309_p10 = por %p10308_p9, %p10307_p8 }
  0x62   :  { %p10310_p11 = pnand %p10309_p10, %p10303_p7 }
  0x64   :  { %10313 = shalt.err (!%p10310_p11)
}
  0x65   :  { %81 = dma.hbm_to_vmem [thread:$0]  %s12201_s13, 16, %s79_s14, [#allocation6]  }
  0x66   :  { %s10314_s30 = scalar_lea.hbm %s12203_s15, 16 }
  0x67   :  { %p10315_p12 = scmp.ne.s32.totalorder %s12203_s15, %s10314_s30  ;;  %p10318_p13 = scmp.lt.u32.totalorder %s10314_s30, %s12203_s15 }
  0x69   :  { %p10320_p0 = pnand %p10318_p13, %p10315_p12 }
  0x6b   :  { %10323 = shalt.err (!%p10320_p0)
}
  0x6c   :  { %s10324_s22 = scalar_lea.vmem %s99_s28, 16  ;;  %s10328_s0 = scalar_lea.vmem %s99_s28, 32 }
  0x6d   :  { %p10325_p1 = scmp.ne.s32.totalorder %s99_s28, %s10324_s22  ;;  %p10329_p2 = scmp.lt.s32.totalorder %s99_s28, %s99_s28 }
  0x6e   :  { %p10330_p3 = scmp.lt.s32.totalorder %s10328_s0, %s10324_s22 }
  0x70   :  { %p10331_p4 = por %p10330_p3, %p10329_p2 }
  0x72   :  { %p10332_p5 = pnand %p10331_p4, %p10325_p1 }
  0x74   :  { %10335 = shalt.err (!%p10332_p5)
}
  0x75   :  { %101 = dma.hbm_to_vmem [thread:$0]  %s12203_s15, 16, %s99_s28, [#allocation9]  }
  0x76   :  { %s10396_s1 = smov [#allocation13]   ;;  %s10336_s29 = scalar_lea.hbm %s12207_s19, 16 }
  0x77   :  { %s122_s23 = sshll.u32 %s10396_s1, 4  ;;  %p10337_p6 = scmp.ne.s32.totalorder %s12207_s19, %s10336_s29  ;;  %s123_s23 = int_to_ptr.vmem [resolvable:$true] %s122_s23 }
  0x78   :  { %p10340_p7 = scmp.lt.u32.totalorder %s10336_s29, %s12207_s19 }
  0x7a   :  { %p10342_p8 = pnand %p10340_p7, %p10337_p6 }
  0x7c   :  { %10345 = shalt.err (!%p10342_p8)
}
  0x7d   :  { %s10346_s30 = scalar_lea.vmem %s123_s23, 16  ;;  %s10350_s15 = scalar_lea.vmem %s123_s23, 32 }
  0x7e   :  { %p10347_p9 = scmp.ne.s32.totalorder %s123_s23, %s10346_s30  ;;  %p10351_p10 = scmp.lt.s32.totalorder %s123_s23, %s123_s23 }
  0x7f   :  { %p10352_p11 = scmp.lt.s32.totalorder %s10350_s15, %s10346_s30 }
  0x81   :  { %p10353_p12 = por %p10352_p11, %p10351_p10 }
  0x83   :  { %p10354_p13 = pnand %p10353_p12, %p10347_p9 }
  0x85   :  { %10357 = shalt.err (!%p10354_p13)
}
  0x86   :  { %125 = dma.hbm_to_vmem [thread:$0]  %s12207_s19, 16, %s123_s23, [#allocation12]  }
  0x87   :  { %10380 = dma.done.wait [#allocation3], 16  }
  0x88   :  { %10381 = vsyncadd [#allocation3], 4294967280 }
  0x89   :  { %10382 = dma.done.wait [#allocation6], 32  }
  0x8a   :  { %10383 = vsyncadd [#allocation6], 4294967264 }
  0x8b   :  { %10384 = dma.done.wait [#allocation9], 32  }
  0x8c   :  { %10385 = vsyncadd [#allocation9], 4294967264 }
  0x8d   :  { %10386 = dma.done.wait [#allocation12], 32  }
  0x8e   :  { %10387 = vsyncadd [#allocation12], 4294967264  ;;  %v12210_v0 = vmov 0.0|0.0   ;;  %vm10398_vm0 = vmmov 0   ;;  %v12221_v1 = vmov 0.0   ;;  %v223_v2 = vld [vmem:[%s12197_s9] sm:$0xff] }
  0x8f   :  { %9436 = vmatprep.subr.bf16.mxu1 %v12210_v0  ;;  %8234 = vmatprep.mubr.msk.f32.mxu1 %vm10398_vm0, %v12221_v1  ;;  %v224_v3 = vld [vmem:[%s12197_s9 + $0x8] sm:$0xff]  ;;  %v225_v4 = vld [vmem:[%s12197_s9 + $0x10] sm:$0xff]  ;;  %vm247_vm1 = vcmask 523264   ;;  %v790_v5 = vand.u32 4294901760, %v223_v2  ;;  %v226_v7 = vld [vmem:[%s12197_s9 + $0x18] sm:$0xff]  ;;  %s12267_s3 = sld [smem:[#allocation59_spill]] }
  0x90   :  { %9364 = vmatprep.subr.bf16.mxu0 %v12210_v0  ;;  %8120 = vmatprep.mubr.msk.f32.mxu0 %vm10398_vm0, %v12221_v1  ;;  %v793_v6 = vand.u32 4294901760, %v224_v3  ;;  %v796_v8 = vand.u32 4294901760, %v225_v4  ;;  %v227_v9 = vld [vmem:[%s12197_s9 + $0x20] sm:$0xff]  ;;  %v228_v10 = vld [vmem:[%s12197_s9 + $0x28] sm:$0xff]  ;;  %v799_v11 = vand.u32 4294901760, %v226_v7  ;;  %v229_v20 = vld [vmem:[%s12197_s9 + $0x30] sm:$0xff] }
  0x91   :  { %v10620_v14 = vsub.f32 %v223_v2, %v790_v5  ;;  %v802_v15 = vand.u32 4294901760, %v227_v9  ;;  %v805_v16 = vand.u32 4294901760, %v228_v10  ;;  %v230_v21 = vld [vmem:[%s12197_s9 + $0x38] sm:$0xff]  ;;  %v808_v31 = vand.u32 4294901760, %v229_v20  ;;  %v215_v48 = vld [vmem:[%s12196_s8] sm:$0xff]  ;;  %v216_v49 = vld [vmem:[%s12196_s8 + $0x8] sm:$0xff] }
  0x92   :  { %v10615_v12 = vpack.c.bf16 %v793_v6, %v790_v5  ;;  %v10623_v18 = vsub.f32 %v224_v3, %v793_v6  ;;  %v10626_v19 = vpack.c.bf16 %v799_v11, %v796_v8  ;;  %v10637_v24 = vsub.f32 %v225_v4, %v796_v8  ;;  %v217_v52 = vld [vmem:[%s12196_s8 + $0x10] sm:$0xff]  ;;  %v218_v53 = vld [vmem:[%s12196_s8 + $0x18] sm:$0xff]  ;;  %v219_v60 = vld [vmem:[%s12196_s8 + $0x20] sm:$0xff]  ;;  %s12286_s17 = sld [smem:[#allocation63_spill]]  ;;  %s12333_s4 = sld [smem:[#allocation61_spill]] }
  0x93   :  { %v875_v23 = vand.u32 4294901760, %v10620_v14  ;;  %v10641_v26 = vsub.f32 %v226_v7, %v799_v11  ;;  %v10643_v27 = vsub.f32 %v227_v9, %v802_v15  ;;  %v10649_v30 = vsub.f32 %v228_v10, %v805_v16  ;;  %v220_v61 = vld [vmem:[%s12196_s8 + $0x28] sm:$0xff]  ;;  %v221_v9 = vld [vmem:[%s12196_s8 + $0x30] sm:$0xff]  ;;  %v222_v10 = vld [vmem:[%s12196_s8 + $0x38] sm:$0xff]  ;;  %s12334_s0 = sld [smem:[#allocation62_spill]] }
  0x94   :  { %9438 = vmatpush3.bf16.msra.mxu1 %v10615_v12  ;;  %v882_v25 = vand.u32 4294901760, %v10623_v18  ;;  %v889_v29 = vand.u32 4294901760, %v10637_v24  ;;  %v811_v32 = vand.u32 4294901760, %v230_v21  ;;  %v10653_v34 = vpack.c.bf16 %v805_v16, %v802_v15 }
  0x95   :  { %v147_v13 = vld [vmem:[%s12267_s3] sm:$0x3f]  ;;  %9439 = vmatprep.subr.bf16.mxu1 %v12210_v0  ;;  %v896_v33 = vand.u32 4294901760, %v10641_v26  ;;  %v876_v36 = vsub.f32 %v10620_v14, %v875_v23  ;;  %v903_v38 = vand.u32 4294901760, %v10643_v27  ;;  %v10666_v39 = vsub.f32 %v229_v20, %v808_v31 }
  0x96   :  { %v249_v17 = vsel %vm247_vm1, %v147_v13, 0  ;;  %v883_v37 = vsub.f32 %v10623_v18, %v882_v25  ;;  %v890_v40 = vsub.f32 %v10637_v24, %v889_v29  ;;  %v910_v41 = vand.u32 4294901760, %v10649_v30 }
  0x97   :  { %v10634_v22 = vand.u32 4294901760, %v249_v17  ;;  %v897_v43 = vsub.f32 %v10641_v26, %v896_v33  ;;  %v10678_v44 = vpack.c.bf16 %v811_v32, %v808_v31  ;;  %v877_v45 = vand.u32 4294901760, %v876_v36 }
  0x98   :  { %9441 = vmatpush3.bf16.msra.mxu1 %v10626_v19  ;;  %v884_v46 = vand.u32 4294901760, %v883_v37  ;;  %v10680_v47 = vsub.f32 %v230_v21, %v811_v32  ;;  %v904_v50 = vsub.f32 %v10643_v27, %v903_v38  ;;  %v917_v51 = vand.u32 4294901760, %v10666_v39 }
  0x99   :  { %v10646_v28 = vsub.f32 %v249_v17, %v10634_v22  ;;  %9442 = vmatprep.subr.bf16.mxu1 %v12210_v0  ;;  %v891_v54 = vand.u32 4294901760, %v890_v40  ;;  %v911_v55 = vsub.f32 %v10649_v30, %v910_v41  ;;  %v898_v57 = vand.u32 4294901760, %v897_v43 }
  0x9a   :  { %v252_v58 = vand.u32 4294901760, %v215_v48  ;;  %v255_v59 = vand.u32 4294901760, %v216_v49  ;;  %v10711_v62 = vpack.c.bf16 %v884_v46, %v877_v45  ;;  %v924_v63 = vand.u32 4294901760, %v10680_v47 }
  0x9b   :  { %v10656_v35 = vand.u32 4294901760, %v10646_v28  ;;  %v258_v2 = vand.u32 4294901760, %v217_v52  ;;  %v261_v3 = vand.u32 4294901760, %v218_v53  ;;  %v905_v4 = vand.u32 4294901760, %v904_v50 }
  0x9c   :  { %9444 = vmatpush3.bf16.msra.mxu1 %v10653_v34  ;;  %v918_v5 = vsub.f32 %v10666_v39, %v917_v51  ;;  %v10718_v6 = vpack.c.bf16 %v255_v59, %v252_v58  ;;  %v264_v7 = vand.u32 4294901760, %v219_v60  ;;  %v267_v8 = vand.u32 4294901760, %v220_v61 }
  0x9d   :  { %v327_v42 = vsub.f32 %v10646_v28, %v10656_v35  ;;  %9445 = vmatprep.subr.bf16.mxu1 %v12210_v0  ;;  %v10726_v11 = vsub.f32 %v215_v48, %v252_v58  ;;  %v10728_v13 = vsub.f32 %v216_v49, %v255_v59  ;;  %v10731_v15 = vpack.c.bf16 %v898_v57, %v891_v54 }
  0x9e   :  { %v912_v16 = vand.u32 4294901760, %v911_v55  ;;  %9366 = vmatpush3.bf16.msra.mxu0 %v10718_v6  ;;  %v10734_v17 = vpack.c.bf16 %v261_v3, %v258_v2  ;;  %v10736_v20 = vsub.f32 %v217_v52, %v258_v2  ;;  %v925_v21 = vsub.f32 %v10680_v47, %v924_v63 }
  0x9f   :  { %v10702_v56 = vand.u32 4294901760, %v327_v42  ;;  %v337_v31 = vand.u32 4294901760, %v10726_v11  ;;  %v344_v32 = vand.u32 4294901760, %v10728_v13  ;;  %v10746_v36 = vsub.f32 %v218_v53, %v261_v3  ;;  %9367 = vmatprep.subr.bf16.mxu0 %v12210_v0 }
  0xa0   :  { %9447 = vmatpush3.bf16.msra.mxu1 %v10678_v44  ;;  %v270_v37 = vand.u32 4294901760, %v221_v9  ;;  %v273_v40 = vand.u32 4294901760, %v222_v10  ;;  %v10750_v42 = vpack.c.bf16 %v267_v8, %v264_v7  ;;  %v351_v43 = vand.u32 4294901760, %v10736_v20 }
  0xa1   :  { %9448 = vmatprep.subr.bf16.mxu1 %v12210_v0  ;;  %v10753_v45 = vsub.f32 %v219_v60, %v264_v7  ;;  %v338_v46 = vsub.f32 %v10726_v11, %v337_v31  ;;  %v345_v48 = vsub.f32 %v10728_v13, %v344_v32  ;;  %v358_v49 = vand.u32 4294901760, %v10746_v36 }
  0xa2   :  { %9369 = vmatpush3.bf16.msra.mxu0 %v10734_v17  ;;  %v10763_v50 = vsub.f32 %v220_v61, %v267_v8  ;;  %v10766_v52 = vpack.c.bf16 %v912_v16, %v905_v4  ;;  %v919_v53 = vand.u32 4294901760, %v918_v5  ;;  %v926_v54 = vand.u32 4294901760, %v925_v21 }
  0xa3   :  { %8235 = vmatmul.mubr.f32.vlgmr.msra.gmra.mrb[0].mxu1 %v10702_v56  ;;  %9370 = vmatprep.subr.bf16.mxu0 %v12210_v0  ;;  %v10770_v55 = vpack.c.bf16 %v273_v40, %v270_v37  ;;  %v352_v57 = vsub.f32 %v10736_v20, %v351_v43  ;;  %v365_v58 = vand.u32 4294901760, %v10753_v45  ;;  %v10776_v59 = vsub.f32 %v221_v9, %v270_v37 }
  0xa4   :  { %9450 = vmatpush3.bf16.msra.mxu1 %v10711_v62  ;;  %8253 = vmatprep.mubr.msk.f32.mxu1 %vm10398_vm0, %v12221_v1  ;;  %v10778_v60 = vsub.f32 %v222_v10, %v273_v40  ;;  %v339_v61 = vand.u32 4294901760, %v338_v46  ;;  %v346_v2 = vand.u32 4294901760, %v345_v48  ;;  %v359_v3 = vsub.f32 %v10746_v36, %v358_v49 }
  0xa5   :  { %9451 = vmatprep.subr.bf16.mxu1 %v12210_v0  ;;  %v372_v4 = vand.u32 4294901760, %v10763_v50  ;;  %v10786_v5 = vpack.c.bf16 %v926_v54, %v919_v53  ;;  %v366_v7 = vsub.f32 %v10753_v45, %v365_v58  ;;  %v379_v8 = vand.u32 4294901760, %v10776_v59 }
  0xa6   :  { %9372 = vmatpush3.bf16.msra.mxu0 %v10750_v42  ;;  %v386_v9 = vand.u32 4294901760, %v10778_v60  ;;  %v10796_v10 = vpack.c.bf16 %v346_v2, %v339_v61  ;;  %v353_v16 = vand.u32 4294901760, %v352_v57  ;;  %v360_v21 = vand.u32 4294901760, %v359_v3 }
  0xa7   :  { %12268 = vst [vmem:[#allocation20_spill] sm:$0xff] %v10786_v5  ;;  %9373 = vmatprep.subr.bf16.mxu0 %v12210_v0  ;;  %v373_v37 = vsub.f32 %v10763_v50, %v372_v4  ;;  %v10804_v40 = vpack.c.bf16 %v10623_v18, %v10620_v14  ;;  %v380_v46 = vsub.f32 %v10776_v59, %v379_v8  ;;  %v367_v53 = vand.u32 4294901760, %v366_v7 }
  0xa8   :  { %9453 = vmatpush3.bf16.msra.mxu1 %v10731_v15  ;;  %v10814_v48 = vpack.c.bf16 %v360_v21, %v353_v16  ;;  %v387_v57 = vsub.f32 %v10778_v60, %v386_v9  ;;  %v10822_v61 = vpack.c.bf16 %v10641_v26, %v10637_v24  ;;  %v10836_v16 = vpack.c.bf16 %v10649_v30, %v10643_v27  ;;  %v166_v30 = vld [vmem:[%s12194_s6] sm:$0x3f] }
  0xa9   :  { %9454 = vmatprep.subr.bf16.mxu1 %v12210_v0  ;;  %12269 = vst [vmem:[#allocation21_spill] sm:$0xff] %v10804_v40  ;;  %v374_v54 = vand.u32 4294901760, %v373_v37  ;;  %v381_v3 = vand.u32 4294901760, %v380_v46  ;;  %v10846_v37 = vpack.c.bf16 %v10680_v47, %v10666_v39  ;;  %v10853_v46 = vpack.c.bf16 %v10728_v13, %v10726_v11  ;;  %v180_v47 = vld [vmem:[%s12195_s7] sm:$0x3f] }
  0xaa   :  { %9375 = vmatpush3.bf16.msra.mxu0 %v10770_v55  ;;  %12270 = vst [vmem:[#allocation22_spill] sm:$0xff] %v10822_v61  ;;  %v388_v7 = vand.u32 4294901760, %v387_v57  ;;  %12271 = vst [vmem:[#allocation23_spill] sm:$0xff] %v10836_v16  ;;  %v10883_v57 = vpack.c.bf16 %v10778_v60, %v10776_v59  ;;  %v10906_v14 = vpack.c.bf16 %v896_v33, %v889_v29  ;;  %v10400_v29 = vmov 0   ;;  %v213_v33 = vld [vmem:[%s12286_s17] sm:$0x3f] }
  0xab   :  { %9376 = vmatprep.subr.bf16.mxu0 %v12210_v0  ;;  %v10831_v2 = vpack.c.bf16 %v374_v54, %v367_v53  ;;  %12273 = vst [vmem:[#allocation25_spill] sm:$0xff] %v10846_v37  ;;  %12274 = vst [vmem:[#allocation26_spill] sm:$0xff] %v10853_v46  ;;  %v10863_v53 = vpack.c.bf16 %v10746_v36, %v10736_v20  ;;  %v10875_v54 = vpack.c.bf16 %v10763_v50, %v10753_v45  ;;  %vm1326_vm2 = vcmask 48128   ;;  %v232_v45 = vld [vmem:[%s12198_s10 + $0x8] sm:$0xff]  ;;  %v233_v59 = vld [vmem:[%s12198_s10 + $0x10] sm:$0xff] }
  0xac   :  { %9456 = vmatpush3.bf16.msra.mxu1 %v10766_v52  ;;  %v10841_v21 = vpack.c.bf16 %v388_v7, %v381_v3  ;;  %12277 = vst [vmem:[#allocation29_spill] sm:$0xff] %v10883_v57  ;;  %v10894_v3 = vpack.c.bf16 %v882_v25, %v875_v23  ;;  %12279 = vst [vmem:[#allocation31_spill] sm:$0xff] %v10906_v14  ;;  %v10920_v18 = vpack.c.bf16 %v910_v41, %v903_v38  ;;  %vm1330_vm3 = vcmask 1045504   ;;  %v234_v60 = vld [vmem:[%s12198_s10 + $0x18] sm:$0xff] }
  0xad   :  { %9457 = vmatprep.subr.bf16.mxu1 %v12210_v0  ;;  %8121 = vmatmul.mubr.f32.vlgmr.msra.gmra.mrb[0].mxu0 %v10702_v56  ;;  %12275 = vst [vmem:[#allocation27_spill] sm:$0xff] %v10863_v53  ;;  %12276 = vst [vmem:[#allocation28_spill] sm:$0xff] %v10875_v54  ;;  %v10930_v23 = vpack.c.bf16 %v924_v63, %v917_v51  ;;  %v10939_v24 = vpack.c.bf16 %v344_v32, %v337_v31  ;;  %v1328_v38 = vsel %vm1326_vm2, %v213_v33, 0  ;;  %vm157_vm4 = vcmask 62464  }
  0xae   :  { %9378 = vmatpush3.bf16.msra.mxu0 %v10796_v10  ;;  %8139 = vmatprep.mubr.msk.f32.mxu0 %vm10398_vm0, %v12221_v1  ;;  %12272 = vst [vmem:[#allocation24_spill] sm:$0xff] %v10841_v21  ;;  %12278 = vst [vmem:[#allocation30_spill] sm:$0xff] %v10894_v3  ;;  %v10951_v25 = vpack.c.bf16 %v358_v49, %v351_v43  ;;  %v10965_v26 = vpack.c.bf16 %v372_v4, %v365_v58  ;;  %v11008_v39 = vand.u32 4294901760, %v1328_v38  ;;  %v231_v43 = vld [vmem:[%s12198_s10] sm:$0xff]  ;;  %vm7480_vm5 = vcmask 406528  }
  0xaf   :  { %9379 = vmatprep.subr.bf16.mxu0 %v12210_v0  ;;  %12280 = vst [vmem:[#allocation32_spill] sm:$0xff] %v10920_v18  ;;  %12281 = vst [vmem:[#allocation33_spill] sm:$0xff] %v10930_v23  ;;  %v10975_v27 = vpack.c.bf16 %v386_v9, %v379_v8  ;;  %10198 = vset.pattern.permute.xlu1 %v10400_v29  ;;  %v1782_v50 = vand.u32 4294901760, %v231_v43  ;;  %v1785_v58 = vand.u32 4294901760, %v232_v45  ;;  %v1788_v7 = vand.u32 4294901760, %v233_v59 }
  0xb0   :  { %9459 = vmatpush3.bf16.msra.mxu1 %v10786_v5  ;;  %12282 = vst [vmem:[#allocation34_spill] sm:$0xff] %v10939_v24  ;;  %12283 = vst [vmem:[#allocation35_spill] sm:$0xff] %v10951_v25  ;;  %10199 = vset.pattern.permute.xlu0 %v10400_v29  ;;  %v11011_v41 = vsub.f32 %v1328_v38, %v11008_v39  ;;  %v1791_v29 = vand.u32 4294901760, %v234_v60  ;;  %v235_v38 = vld [vmem:[%s12198_s10 + $0x20] sm:$0xff]  ;;  %vm7488_vm6 = vcmask 401408  }
  0xb1   :  { %9460 = vmatprep.subr.bf16.mxu1 %v12210_v0  ;;  %12284 = vst [vmem:[#allocation36_spill] sm:$0xff] %v10965_v26  ;;  %12285 = vst [vmem:[#allocation37_spill] sm:$0xff] %v10975_v27  ;;  %170 = vperm.xlu1 %10198, %v166_v30   ;;  %v11046_v8 = vsub.f32 %v231_v43, %v1782_v50  ;;  %v11050_v30 = vsub.f32 %v232_v45, %v1785_v58  ;;  %v241_v45 = vld [vmem:[%s12199_s11 + $0x10] sm:$0xff] }
  0xb2   :  { %9381 = vmatpush3.bf16.msra.mxu0 %v10814_v48  ;;  %12287 = vst [vmem:[#allocation38_spill] sm:$0xff] %v11008_v39  ;;  %12288 = vst [vmem:[#allocation39_spill] sm:$0xff] %v11011_v41  ;;  %v11017_v51 = vand.u32 4294901760, %v11011_v41  ;;  %v11053_v33 = vpack.c.bf16 %v1785_v58, %v1782_v50  ;;  %v11079_v43 = vsub.f32 %v234_v60, %v1791_v29 }
  0xb3   :  { %8254 = vmatmul.mubr.f32.vlgmr.msra.gmra.mrb[0].mxu1 %v10634_v22  ;;  %9382 = vmatprep.subr.bf16.mxu0 %v12210_v0  ;;  %v11092_v58 = vpack.c.bf16 %v1791_v29, %v1788_v7  ;;  %v2327_v29 = vand.u32 4294901760, %v241_v45 }
  0xb4   :  { %9462 = vmatpush3.bf16.msra.mxu1 %v10804_v40  ;;  %8272 = vmatprep.mubr.msk.f32.mxu1 %vm10398_vm0, %v12221_v1  ;;  %12289 = vst [vmem:[#allocation40_spill] sm:$0xff] %v11017_v51  ;;  %v1403_v63 = vsub.f32 %v11011_v41, %v11017_v51 }
  0xb5   :  { %9463 = vmatprep.subr.bf16.mxu1 %v12210_v0  ;;  %184 = vperm.xlu1 %10198, %v180_v47   ;;  %v239_v47 = vld [vmem:[%s12199_s11] sm:$0xff] }
  0xb6   :  { %9384 = vmatpush3.bf16.msra.mxu0 %v10831_v2  ;;  %v11022_v31 = vand.u32 4294901760, %v1403_v63  ;;  %v240_v63 = vld [vmem:[%s12199_s11 + $0x8] sm:$0xff] }
  0xb7   :  { %9385 = vmatprep.subr.bf16.mxu0 %v12210_v0  ;;  %v2324_v60 = vand.u32 4294901760, %v240_v63 }
  0xb8   :  { %9465 = vmatpush3.bf16.msra.mxu1 %v10822_v61  ;;  %12290 = vst [vmem:[#allocation41_spill] sm:$0xff] %v11022_v31 }
  0xb9   :  { %9466 = vmatprep.subr.bf16.mxu1 %v12210_v0 }
  0xba   :  { %9387 = vmatpush3.bf16.msra.mxu0 %v10841_v21 }
  0xbb   :  { %9388 = vmatprep.subr.bf16.mxu0 %v12210_v0 }
  0xbc   :  { %9468 = vmatpush3.bf16.msra.mxu1 %v10836_v16 }
  0xbd   :  { %9469 = vmatprep.subr.bf16.mxu1 %v12210_v0  ;;  %8140 = vmatmul.mubr.f32.vlgmr.msra.gmra.mrb[0].mxu0 %v10634_v22 }
  0xbe   :  { %9390 = vmatpush3.bf16.msra.mxu0 %v10853_v46  ;;  %8158 = vmatprep.mubr.msk.f32.mxu0 %vm10398_vm0, %v12221_v1 }
  0xbf   :  { %9391 = vmatprep.subr.bf16.mxu0 %v12210_v0 }
  0xc0   :  { %9471 = vmatpush3.bf16.msra.mxu1 %v10846_v37 }
  0xc1   :  { %9472 = vmatprep.subr.bf16.mxu1 %v12210_v0 }
  0xc2   :  { %9393 = vmatpush3.bf16.msra.mxu0 %v10863_v53 }
  0xc3   :  { %8273 = vmatmul.mubr.f32.vlgmr.msra.gmra.mrb[0].mxu1 %v10646_v28  ;;  %9394 = vmatprep.subr.bf16.mxu0 %v12210_v0 }
  0xc4   :  { %9474 = vmatpush3.bf16.msra.mxu1 %v10615_v12  ;;  %8291 = vmatprep.mubr.msk.f32.mxu1 %vm10398_vm0, %v12221_v1 }
  0xc5   :  { %9475 = vmatprep.subr.bf16.mxu1 %v12210_v0 }
  0xc6   :  { %9396 = vmatpush3.bf16.msra.mxu0 %v10875_v54 }
  0xc7   :  { %9397 = vmatprep.subr.bf16.mxu0 %v12210_v0 }
  0xc8   :  { %9477 = vmatpush3.bf16.msra.mxu1 %v10626_v19 }
  0xc9   :  { %9478 = vmatprep.subr.bf16.mxu1 %v12210_v0 }
  0xca   :  { %9399 = vmatpush3.bf16.msra.mxu0 %v10883_v57 }
  0xcb   :  { %9400 = vmatprep.subr.bf16.mxu0 %v12210_v0 }
  0xcc   :  { %9480 = vmatpush3.bf16.msra.mxu1 %v10653_v34 }
  0xcd   :  { %9481 = vmatprep.subr.bf16.mxu1 %v12210_v0  ;;  %8159 = vmatmul.mubr.f32.vlgmr.msra.gmra.mrb[0].mxu0 %v10646_v28 }
  0xce   :  { %9402 = vmatpush3.bf16.msra.mxu0 %v10718_v6  ;;  %8177 = vmatprep.mubr.msk.f32.mxu0 %vm10398_vm0, %v12221_v1 }
  0xcf   :  { %9403 = vmatprep.subr.bf16.mxu0 %v12210_v0 }
  0xd0   :  { %9483 = vmatpush3.bf16.msra.mxu1 %v10678_v44 }
  0xd1   :  { %9484 = vmatprep.subr.bf16.mxu1 %v12210_v0 }
  0xd2   :  { %9405 = vmatpush3.bf16.msra.mxu0 %v10734_v17 }
  0xd3   :  { %8292 = vmatmul.mubr.f32.vlgmr.msra.gmra.mrb[0].mxu1 %v10656_v35  ;;  %9406 = vmatprep.subr.bf16.mxu0 %v12210_v0 }
  0xd4   :  { %9486 = vmatpush3.bf16.msra.mxu1 %v10894_v3  ;;  %8310 = vmatprep.mubr.msk.f32.mxu1 %vm10398_vm0, %v12221_v1  ;;  %v11114_v3 = vsub.f32 %v240_v63, %v2324_v60 }
  0xd5   :  { %9487 = vmatprep.subr.bf16.mxu1 %v12210_v0 }
  0xd6   :  { %9408 = vmatpush3.bf16.msra.mxu0 %v10750_v42 }
  0xd7   :  { %9409 = vmatprep.subr.bf16.mxu0 %v12210_v0 }
  0xd8   :  { %9489 = vmatpush3.bf16.msra.mxu1 %v10906_v14 }
  0xd9   :  { %9490 = vmatprep.subr.bf16.mxu1 %v12210_v0 }
  0xda   :  { %9411 = vmatpush3.bf16.msra.mxu0 %v10770_v55 }
  0xdb   :  { %9412 = vmatprep.subr.bf16.mxu0 %v12210_v0 }
  0xdc   :  { %9492 = vmatpush3.bf16.msra.mxu1 %v10920_v18 }
  0xdd   :  { %9493 = vmatprep.subr.bf16.mxu1 %v12210_v0  ;;  %8178 = vmatmul.mubr.f32.vlgmr.msra.gmra.mrb[0].mxu0 %v10656_v35 }
  0xde   :  { %9414 = vmatpush3.bf16.msra.mxu0 %v10939_v24  ;;  %8196 = vmatprep.mubr.msk.f32.mxu0 %vm10398_vm0, %v12221_v1  ;;  %v12295_v24 = vand.u32 4294901760, %v11079_v43 }
  0xdf   :  { %9415 = vmatprep.subr.bf16.mxu0 %v12210_v0 }
  0xe0   :  { %9495 = vmatpush3.bf16.msra.mxu1 %v10930_v23  ;;  %v1889_v37 = vsub.f32 %v11079_v43, %v12295_v24 }
  0xe1   :  { %9496 = vmatprep.subr.bf16.mxu1 %v12210_v0 }
  0xe2   :  { %9417 = vmatpush3.bf16.msra.mxu0 %v10951_v25  ;;  %v1890_v61 = vand.u32 4294901760, %v1889_v37 }
  0xe3   :  { %8311 = vmatmul.mubr.f32.vlgmr.msra.gmra.mrb[0].mxu1 %v10634_v22  ;;  %9418 = vmatprep.subr.bf16.mxu0 %v12210_v0 }
  0xe4   :  { %9498 = vmatpush3.bf16.msra.mxu1 %v10615_v12  ;;  %8329 = vmatprep.mubr.msk.f32.mxu1 %vm10398_vm0, %v12221_v1 }
  0xe5   :  { %9499 = vmatprep.subr.bf16.mxu1 %v12210_v0 }
  0xe6   :  { %9420 = vmatpush3.bf16.msra.mxu0 %v10965_v26  ;;  %v12292_v26 = vand.u32 4294901760, %v11046_v8 }
  0xe7   :  { %9421 = vmatprep.subr.bf16.mxu0 %v12210_v0 }
  0xe8   :  { %9501 = vmatpush3.bf16.msra.mxu1 %v10626_v19  ;;  %v1868_v14 = vsub.f32 %v11046_v8, %v12292_v26 }
  0xe9   :  { %9502 = vmatprep.subr.bf16.mxu1 %v12210_v0 }
  0xea   :  { %9423 = vmatpush3.bf16.msra.mxu0 %v10975_v27 }
  0xeb   :  { %9424 = vmatprep.subr.bf16.mxu0 %v12210_v0 }
  0xec   :  { %9504 = vmatpush3.bf16.msra.mxu1 %v10653_v34 }
  0xed   :  { %9505 = vmatprep.subr.bf16.mxu1 %v12210_v0  ;;  %8197 = vmatmul.mubr.f32.vlgmr.msra.gmra.mrb[0].mxu0 %v10634_v22 }
  0xee   :  { %9426 = vmatpush3.bf16.msra.mxu0 %v10718_v6  ;;  %8215 = vmatprep.mubr.msk.f32.mxu0 %vm10398_vm0, %v12221_v1 }
  0xef   :  { %9427 = vmatprep.subr.bf16.mxu0 %v12210_v0 }
  0xf0   :  { %9507 = vmatpush3.bf16.msra.mxu1 %v10678_v44 }
  0xf1   :  { %8337 = vmatprep.subr.mxu1 %v12221_v1 }
  0xf2   :  { %9429 = vmatpush3.bf16.msra.mxu0 %v10734_v17 }
  0xf3   :  { %8330 = vmatmul.mubr.f32.vlgmr.msra.gmra.mrb[0].mxu1 %v10634_v22  ;;  %9430 = vmatprep.subr.bf16.mxu0 %v12210_v0 }
  0xf4   :  { %8339 = vmatprep.mubr.msk.f32.mxu1 %vm10398_vm0, %v12221_v1 }
  0xf6   :  { %9432 = vmatpush3.bf16.msra.mxu0 %v10750_v42 }
  0xf7   :  { %9433 = vmatprep.subr.bf16.mxu0 %v12210_v0 }
  0xfa   :  { %9435 = vmatpush3.bf16.msra.mxu0 %v10770_v55 }
  0xfb   :  { %8332 = vmatprep.subr.mxu0 %v12221_v1 }
  0xfd   :  { %8216 = vmatmul.mubr.f32.vlgmr.msra.gmra.mrb[0].mxu0 %v10634_v22 }
  0xfe   :  { %8334 = vmatprep.mubr.msk.f32.mxu0 %vm10398_vm0, %v12221_v1 }
 0x1c6   :  { %v1322_v11 = vpop.f32.mrb[0].mxu1 }
 0x1c7   :  { %v1332_v13 = vsel %vm1330_vm3, %v1322_v11, 0  ;;  %v8331_v20 = vpop.f32.mrb[1].mxu1  ;;  %v236_v11 = vld [vmem:[%s12198_s10 + $0x28] sm:$0xff] }
 0x1c8   :  { %v11024_v32 = vand.u32 4294901760, %v1332_v13  ;;  %v11075_v20 = vld [vmem:[%s12198_s10 + $0x38] sm:$0xff] }
 0x1c9   :  { %v1803_v50 = vand.u32 4294901760, %v11075_v20 }
 0x1ca   :  { %v1412_v36 = vsub.f32 %v1332_v13, %v11024_v32  ;;  %8333 = vmatpush3.msra.mxu0 %v11024_v32  ;;  %v11070_v13 = vld [vmem:[%s12198_s10 + $0x30] sm:$0xff] }
 0x1cb   :  { %8335 = vmatmul.mubr.f32.vlgmr.msra.gmra.mrb[2].mxu0 %v11022_v31  ;;  %8342 = vmatprep.subr.mxu0 %v12221_v1 }
 0x1cc   :  { %v1413_v49 = vand.u32 4294901760, %v1412_v36  ;;  %8343 = vmatpush3.msra.mxu0 %v1412_v36  ;;  %8344 = vmatprep.mubr.msk.f32.mxu0 %vm10398_vm0, %v12221_v1 }
 0x1cd   :  { %8352 = vmatprep.subr.mxu0 %v12221_v1 }
 0x1ce   :  { %v1414_v4 = vsub.f32 %v1412_v36, %v1413_v49  ;;  %v11077_v36 = vsub.f32 %v233_v59, %v1788_v7  ;;  %v2321_v59 = vand.u32 4294901760, %v239_v47  ;;  %v12291_v7 = vmov 0.0|0.0  }
 0x1cf   :  { %8345 = vmatmul.mubr.f32.vlgmr.msra.gmra.mrb[4].mxu0 %v11011_v41  ;;  %v1800_v41 = vand.u32 4294901760, %v11070_v13 }
 0x1d0   :  { %v1415_v9 = vand.u32 4294901760, %v1414_v4  ;;  %8353 = vmatpush3.msra.mxu0 %v1413_v49  ;;  %8354 = vmatprep.mubr.msk.f32.mxu0 %vm10398_vm0, %v12221_v1  ;;  %v242_v49 = vld [vmem:[%s12199_s11 + $0x18] sm:$0xff]  ;;  %v11100_v31 = vpop.f32.mrb[0].mxu0  ;;  %v11112_v25 = vsub.f32 %v239_v47, %v2321_v59  ;;  %v11119_v27 = vpack.c.bf16 %v2324_v60, %v2321_v59  ;;  %v243_v47 = vld [vmem:[%s12199_s11 + $0x20] sm:$0xff] }
 0x1d1   :  { %9508 = vmatprep.subr.bf16.mxu0 %v12210_v0  ;;  %v1797_v0 = vand.u32 4294901760, %v236_v11  ;;  %v2330_v23 = vand.u32 4294901760, %v242_v49  ;;  %v8217_v18 = vpop.f32.mrb[1].mxu0  ;;  %v11139_v60 = vpack.c.bf16 %v1803_v50, %v1800_v41  ;;  %v2333_v16 = vand.u32 4294901760, %v243_v47 }
 0x1d2   :  { %8338 = vmatpush3.msra.mxu1 %v1415_v9  ;;  %v1794_v9 = vand.u32 4294901760, %v235_v38  ;;  %v12293_v18 = vand.u32 4294901760, %v11050_v30  ;;  %v12297_v53 = vand.u32 4294901760, %v11112_v25 }
 0x1d3   :  { %8340 = vmatmul.mubr.f32.vlgmr.msra.gmra.mrb[2].mxu1 %v11008_v39  ;;  %8347 = vmatprep.subr.mxu1 %v12221_v1  ;;  %v11136_v59 = vsub.f32 %v236_v11, %v1797_v0  ;;  %v246_v11 = vld [vmem:[%s12199_s11 + $0x38] sm:$0xff]  ;;  %v11163_v54 = vsub.f32 %v242_v49, %v2330_v23 }
 0x1d4   :  { %8355 = vmatmul.mubr.f32.vlgmr.msra.gmra.mrb[6].mxu0 %v11008_v39  ;;  %8348 = vmatpush3.msra.mxu1 %v11024_v32  ;;  %v1875_v4 = vsub.f32 %v11050_v30, %v12293_v18  ;;  %v11126_v26 = vpack.c.bf16 %v1797_v0, %v1794_v9  ;;  %v11134_v63 = vsub.f32 %v235_v38, %v1794_v9  ;;  %v1869_v38 = vand.u32 4294901760, %v1868_v14  ;;  %v245_v0 = vld [vmem:[%s12199_s11 + $0x30] sm:$0xff] }
 0x1d5   :  { %9510 = vmatpush3.bf16.msra.mxu0 %v11053_v33  ;;  %8349 = vmatprep.mubr.msk.f32.mxu1 %vm10398_vm0, %v12221_v1  ;;  %v11141_v18 = vpack.c.bf16 %v2330_v23, %v2327_v29  ;;  %v12296_v14 = vmov 0.0   ;;  %v2339_v23 = vand.u32 4294901760, %v245_v0  ;;  %v2342_v49 = vand.u32 4294901760, %v246_v11 }
 0x1d6   :  { %8357 = vmatprep.subr.mxu1 %v12221_v1  ;;  %9511 = vmatprep.subr.bf16.mxu0 %v12291_v7  ;;  %v1876_v24 = vand.u32 4294901760, %v1875_v4  ;;  %v11173_v4 = vsub.f32 %v11075_v20, %v1803_v50  ;;  %v2407_v40 = vsub.f32 %v11112_v25, %v12297_v53  ;;  %v12298_v9 = vand.u32 4294901760, %v11114_v3 }
 0x1d7   :  { %8350 = vmatmul.mubr.f32.vlgmr.msra.gmra.mrb[4].mxu1 %v11017_v51  ;;  %8378 = vmatprep.mubr.msk.f32.mxu0 %vm10398_vm0, %v12221_v1  ;;  %v12299_v53 = vand.u32 4294901760, %v11134_v63 }
 0x1d8   :  { %8358 = vmatpush3.msra.mxu1 %v11024_v32  ;;  %8359 = vmatprep.mubr.msk.f32.mxu1 %vm10398_vm0, %v12221_v1  ;;  %v244_v32 = vld [vmem:[%s12199_s11 + $0x28] sm:$0xff]  ;;  %v12294_v1 = vand.u32 4294901760, %v11077_v36  ;;  %v2414_v57 = vsub.f32 %v11114_v3, %v12298_v9  ;;  %v11186_v20 = vpack.c.bf16 %v1876_v24, %v1869_v38  ;;  %v2408_v24 = vand.u32 4294901760, %v2407_v40 }
 0x1d9   :  { %9513 = vmatpush3.bf16.msra.mxu0 %v11092_v58  ;;  %9580 = vmatprep.subr.bf16.mxu1 %v12291_v7  ;;  %v1896_v9 = vsub.f32 %v11134_v63, %v12299_v53  ;;  %v11220_v40 = vsub.f32 %v246_v11, %v2342_v49  ;;  %v12304_v21 = vand.u32 4294901760, %v11173_v4 }
 0x1da   :  { %9514 = vmatprep.subr.bf16.mxu0 %v12291_v7  ;;  %v1882_v51 = vsub.f32 %v11077_v36, %v12294_v1  ;;  %v11158_v1 = vsub.f32 %v241_v45, %v2327_v29  ;;  %v11170_v45 = vsub.f32 %v11070_v13, %v1800_v41  ;;  %v11183_v13 = vsub.f32 %v243_v47, %v2333_v16 }
 0x1db   :  { %8360 = vmatmul.mubr.f32.vlgmr.msra.gmra.mrb[6].mxu1 %v11008_v39  ;;  %v2336_v39 = vand.u32 4294901760, %v244_v32  ;;  %v12300_v47 = vand.u32 4294901760, %v11136_v59  ;;  %v2415_v37 = vand.u32 4294901760, %v2414_v57 }
 0x1dc   :  { %9582 = vmatpush3.bf16.msra.mxu1 %v11119_v27  ;;  %8492 = vmatprep.mubr.msk.f32.mxu1 %vm10398_vm0, %v12296_v14  ;;  %v1883_v29 = vand.u32 4294901760, %v1882_v51  ;;  %v12237_v38 = vand.u32 4294901760, %v11170_v45  ;;  %v12302_v46 = vand.u32 4294901760, %v11158_v1 }
 0x1dd   :  { %9516 = vmatpush3.bf16.msra.mxu0 %v11126_v26  ;;  %9583 = vmatprep.subr.bf16.mxu1 %v12291_v7  ;;  %v11188_v51 = vpack.c.bf16 %v2336_v39, %v2333_v16  ;;  %v11191_v50 = vsub.f32 %v244_v32, %v2336_v39  ;;  %v1903_v41 = vsub.f32 %v11136_v59, %v12300_v47  ;;  %v12303_v47 = vand.u32 4294901760, %v11163_v54 }
 0x1de   :  { %9517 = vmatprep.subr.bf16.mxu0 %v12291_v7  ;;  %v11204_v39 = vpack.c.bf16 %v1890_v61, %v1883_v29  ;;  %v11206_v32 = vpack.c.bf16 %v2342_v49, %v2339_v23  ;;  %v2421_v53 = vsub.f32 %v11158_v1, %v12302_v46  ;;  %v11218_v29 = vsub.f32 %v245_v0, %v2339_v23 }
 0x1df   :  { %v2428_v16 = vsub.f32 %v11163_v54, %v12303_v47  ;;  %v12238_v61 = vand.u32 4294901760, %v11191_v50  ;;  %v1897_v46 = vand.u32 4294901760, %v1896_v9  ;;  %v1904_v57 = vand.u32 4294901760, %v1903_v41 }
 0x1e0   :  { %9585 = vmatpush3.bf16.msra.mxu1 %v11141_v18  ;;  %12301 = vst [vmem:[#allocation42_spill] sm:$0xff] %v11204_v39  ;;  %v1910_v5 = vsub.f32 %v11170_v45, %v12237_v38  ;;  %v1917_v47 = vsub.f32 %v11173_v4, %v12304_v21  ;;  %v11233_v0 = vpack.c.bf16 %v2415_v37, %v2408_v24  ;;  %v2422_v11 = vand.u32 4294901760, %v2421_v53 }
 0x1e1   :  { %9519 = vmatpush3.bf16.msra.mxu0 %v11139_v60  ;;  %9586 = vmatprep.subr.bf16.mxu1 %v12291_v7  ;;  %v12305_v23 = vand.u32 4294901760, %v11183_v13  ;;  %v2429_v41 = vand.u32 4294901760, %v2428_v16  ;;  %v2442_v9 = vsub.f32 %v11191_v50, %v12238_v61  ;;  %v12240_v21 = vand.u32 4294901760, %v11218_v29 }
 0x1e2   :  { %9520 = vmatprep.subr.bf16.mxu0 %v12291_v7  ;;  %v11246_v37 = vpack.c.bf16 %v1904_v57, %v1897_v46  ;;  %v1911_v24 = vand.u32 4294901760, %v1910_v5  ;;  %v1918_v53 = vand.u32 4294901760, %v1917_v47 }
 0x1e3   :  { %v2435_v49 = vsub.f32 %v11183_v13, %v12305_v23  ;;  %v11251_v23 = vpack.c.bf16 %v2429_v41, %v2422_v11  ;;  %v2443_v61 = vand.u32 4294901760, %v2442_v9  ;;  %v2449_v38 = vsub.f32 %v11218_v29, %v12240_v21 }
 0x1e4   :  { %8379 = vmatmul.mubr.f32.vlgmr.msra.gmra.mrb[8].mxu0 %v10702_v56  ;;  %9588 = vmatpush3.bf16.msra.mxu1 %v11188_v51  ;;  %v11305_v41 = vpack.c.bf16 %v11163_v54, %v11158_v1  ;;  %v11313_v9 = vpack.c.bf16 %v11173_v4, %v11170_v45 }
 0x1e5   :  { %9522 = vmatpush3.bf16.msra.mxu0 %v11186_v20  ;;  %9589 = vmatprep.subr.bf16.mxu1 %v12291_v7  ;;  %v2436_v16 = vand.u32 4294901760, %v2435_v49  ;;  %v2450_v57 = vand.u32 4294901760, %v2449_v38  ;;  %v11284_v38 = vpack.c.bf16 %v11079_v43, %v11077_v36  ;;  %v11298_v49 = vpack.c.bf16 %v11136_v59, %v11134_v63 }
 0x1e6   :  { %9523 = vmatprep.subr.bf16.mxu0 %v12291_v7  ;;  %8397 = vmatprep.mubr.msk.f32.mxu0 %vm10398_vm0, %v12296_v14 }
 0x1e7   :  { %v11267_v5 = vpack.c.bf16 %v2443_v61, %v2436_v16  ;;  %v11292_v61 = vpack.c.bf16 %v11114_v3, %v11112_v25  ;;  %v12309_v16 = vand.u32 4294901760, %v11046_v8 }
 0x1e8   :  { %9591 = vmatpush3.bf16.msra.mxu1 %v11206_v32 }
 0x1e9   :  { %9525 = vmatpush3.bf16.msra.mxu0 %v11204_v39  ;;  %9592 = vmatprep.subr.bf16.mxu1 %v12291_v7  ;;  %v12306_v39 = vand.u32 4294901760, %v11220_v40 }
 0x1ea   :  { %9526 = vmatprep.subr.bf16.mxu0 %v12291_v7 }
 0x1eb   :  { %8493 = vmatmul.mubr.f32.vlgmr.msra.gmra.mrb[8].mxu1 %v10702_v56  ;;  %v2456_v46 = vsub.f32 %v11220_v40, %v12306_v39  ;;  %v11263_v56 = vpack.c.bf16 %v1918_v53, %v1911_v24  ;;  %v11273_v39 = vpack.c.bf16 %v11050_v30, %v11046_v8  ;;  %v11319_v24 = vpack.c.bf16 %v11191_v50, %v11183_v13 }
 0x1ec   :  { %9594 = vmatpush3.bf16.msra.mxu1 %v11233_v0  ;;  %8511 = vmatprep.mubr.msk.f32.mxu1 %vm10398_vm0, %v12296_v14  ;;  %v11328_v53 = vpack.c.bf16 %v11220_v40, %v11218_v29  ;;  %v12315_v8 = vand.u32 4294901760, %v11112_v25  ;;  %v12322_v25 = vand.u32 4294901760, %v11163_v54  ;;  %v12327_v54 = vand.u32 4294901760, %v11183_v13 }
 0x1ed   :  { %9528 = vmatpush3.bf16.msra.mxu0 %v11246_v37  ;;  %9595 = vmatprep.subr.bf16.mxu1 %v12291_v7  ;;  %v2457_v47 = vand.u32 4294901760, %v2456_v46  ;;  %12307 = vst [vmem:[#allocation43_spill] sm:$0xff] %v11319_v24 }
 0x1ee   :  { %9529 = vmatprep.subr.bf16.mxu0 %v12291_v7  ;;  %12308 = vst [vmem:[#allocation44_spill] sm:$0xff] %v11328_v53 }
 0x1ef   :  { %v11278_v11 = vpack.c.bf16 %v2457_v47, %v2450_v57  ;;  %v12312_v57 = vand.u32 4294901760, %v11077_v36  ;;  %v12313_v47 = vand.u32 4294901760, %v11079_v43  ;;  %v12318_v36 = vand.u32 4294901760, %v11134_v63 }
 0x1f0   :  { %9597 = vmatpush3.bf16.msra.mxu1 %v11251_v23  ;;  %v12319_v43 = vand.u32 4294901760, %v11136_v59  ;;  %v12324_v63 = vand.u32 4294901760, %v11170_v45  ;;  %v12325_v59 = vand.u32 4294901760, %v11173_v4  ;;  %v12330_v45 = vand.u32 4294901760, %v11218_v29 }
 0x1f1   :  { %9531 = vmatpush3.bf16.msra.mxu0 %v11263_v56  ;;  %9598 = vmatprep.subr.bf16.mxu1 %v12291_v7  ;;  %v11364_v21 = vpack.c.bf16 %v12313_v47, %v12312_v57  ;;  %v12331_v4 = vand.u32 4294901760, %v11220_v40 }
 0x1f2   :  { %9532 = vmatprep.subr.bf16.mxu0 %v12291_v7 }
 0x1f3   :  { %12314 = vst [vmem:[#allocation46_spill] sm:$0xff] %v11364_v21 }
 0x1f4   :  { %8398 = vmatmul.mubr.f32.vlgmr.msra.gmra.mrb[8].mxu0 %v10634_v22  ;;  %9600 = vmatpush3.bf16.msra.mxu1 %v11267_v5 }
 0x1f5   :  { %9534 = vmatpush3.bf16.msra.mxu0 %v11273_v39  ;;  %9601 = vmatprep.subr.bf16.mxu1 %v12291_v7 }
 0x1f6   :  { %9535 = vmatprep.subr.bf16.mxu0 %v12291_v7  ;;  %8416 = vmatprep.mubr.msk.f32.mxu0 %vm10398_vm0, %v12296_v14 }
 0x1f8   :  { %9603 = vmatpush3.bf16.msra.mxu1 %v11278_v11 }
 0x1f9   :  { %9537 = vmatpush3.bf16.msra.mxu0 %v11284_v38  ;;  %9604 = vmatprep.subr.bf16.mxu1 %v12291_v7 }
 0x1fa   :  { %9538 = vmatprep.subr.bf16.mxu0 %v12291_v7 }
 0x1fb   :  { %8512 = vmatmul.mubr.f32.vlgmr.msra.gmra.mrb[8].mxu1 %v10634_v22 }
 0x1fc   :  { %9606 = vmatpush3.bf16.msra.mxu1 %v11292_v61  ;;  %8530 = vmatprep.mubr.msk.f32.mxu1 %vm10398_vm0, %v12296_v14 }
 0x1fd   :  { %9540 = vmatpush3.bf16.msra.mxu0 %v11298_v49  ;;  %9607 = vmatprep.subr.bf16.mxu1 %v12291_v7 }
 0x1fe   :  { %9541 = vmatprep.subr.bf16.mxu0 %v12291_v7 }
 0x200   :  { %9609 = vmatpush3.bf16.msra.mxu1 %v11305_v41 }
 0x201   :  { %9543 = vmatpush3.bf16.msra.mxu0 %v11313_v9  ;;  %9610 = vmatprep.subr.bf16.mxu1 %v12291_v7 }
 0x202   :  { %9544 = vmatprep.subr.bf16.mxu0 %v12291_v7 }
 0x204   :  { %8417 = vmatmul.mubr.f32.vlgmr.msra.gmra.mrb[8].mxu0 %v10646_v28  ;;  %9612 = vmatpush3.bf16.msra.mxu1 %v11319_v24 }
 0x205   :  { %9546 = vmatpush3.bf16.msra.mxu0 %v11053_v33  ;;  %9613 = vmatprep.subr.bf16.mxu1 %v12291_v7 }
 0x206   :  { %9547 = vmatprep.subr.bf16.mxu0 %v12291_v7  ;;  %8435 = vmatprep.mubr.msk.f32.mxu0 %vm10398_vm0, %v12296_v14 }
 0x208   :  { %9615 = vmatpush3.bf16.msra.mxu1 %v11328_v53 }
 0x209   :  { %9549 = vmatpush3.bf16.msra.mxu0 %v11092_v58  ;;  %9616 = vmatprep.subr.bf16.mxu1 %v12291_v7 }
 0x20a   :  { %9550 = vmatprep.subr.bf16.mxu0 %v12291_v7 }
 0x20b   :  { %8531 = vmatmul.mubr.f32.vlgmr.msra.gmra.mrb[8].mxu1 %v10646_v28  ;;  %v12310_v28 = vand.u32 4294901760, %v11050_v30  ;;  %v12316_v30 = vand.u32 4294901760, %v11114_v3  ;;  %v12321_v3 = vand.u32 4294901760, %v11158_v1  ;;  %v12328_v1 = vand.u32 4294901760, %v11191_v50 }
 0x20c   :  { %9618 = vmatpush3.bf16.msra.mxu1 %v11119_v27  ;;  %8549 = vmatprep.mubr.msk.f32.mxu1 %vm10398_vm0, %v12296_v14 }
 0x20d   :  { %9552 = vmatpush3.bf16.msra.mxu0 %v11126_v26  ;;  %9619 = vmatprep.subr.bf16.mxu1 %v12291_v7  ;;  %v11353_v46 = vpack.c.bf16 %v12310_v28, %v12309_v16  ;;  %v11374_v16 = vpack.c.bf16 %v12316_v30, %v12315_v8  ;;  %v11382_v28 = vpack.c.bf16 %v12319_v43, %v12318_v36  ;;  %v7508_v30 = vld [vmem:[#allocation2] ss:$0 sm:$0xff] }
 0x20e   :  { %9553 = vmatprep.subr.bf16.mxu0 %v12291_v7  ;;  %v11391_v57 = vpack.c.bf16 %v12322_v25, %v12321_v3  ;;  %v11409_v47 = vpack.c.bf16 %v12328_v1, %v12327_v54  ;;  %v11420_v8 = vpack.c.bf16 %v12331_v4, %v12330_v45  ;;  %v149_v36 = vld [vmem:[%s12333_s4] sm:$0x3f] }
 0x20f   :  { %12311 = vst [vmem:[#allocation45_spill] sm:$0xff] %v11353_v46  ;;  %12317 = vst [vmem:[#allocation47_spill] sm:$0xff] %v11374_v16  ;;  %v156_v43 = vmul.f32 %v7508_v30, %v149_v36  ;;  %v161_v3 = vld [vmem:[%s12334_s0] sm:$0x3f] }
 0x210   :  { %9621 = vmatpush3.bf16.msra.mxu1 %v11141_v18  ;;  %12320 = vst [vmem:[#allocation48_spill] sm:$0xff] %v11382_v28  ;;  %12323 = vst [vmem:[#allocation49_spill] sm:$0xff] %v11391_v57  ;;  %v162_v25 = vmul.f32 %v7508_v30, %v161_v3 }
 0x211   :  { %9555 = vmatpush3.bf16.msra.mxu0 %v11139_v60  ;;  %9622 = vmatprep.subr.bf16.mxu1 %v12291_v7  ;;  %12329 = vst [vmem:[#allocation51_spill] sm:$0xff] %v11409_v47  ;;  %12332 = vst [vmem:[#allocation52_spill] sm:$0xff] %v11420_v8 }
 0x212   :  { %9556 = vmatprep.subr.bf16.mxu0 %v12291_v7  ;;  %v163_v4 = vsel %vm157_vm4, %v162_v25, 0.0 }
 0x214   :  { %8436 = vmatmul.mubr.f32.vlgmr.msra.gmra.mrb[8].mxu0 %v10656_v35  ;;  %9624 = vmatpush3.bf16.msra.mxu1 %v11188_v51 }
 0x215   :  { %9558 = vmatpush3.bf16.msra.mxu0 %v11353_v46  ;;  %9625 = vmatprep.subr.bf16.mxu1 %v12291_v7 }
 0x216   :  { %9559 = vmatprep.subr.bf16.mxu0 %v12291_v7  ;;  %8454 = vmatprep.mubr.msk.f32.mxu0 %vm10398_vm0, %v12296_v14 }
 0x218   :  { %9627 = vmatpush3.bf16.msra.mxu1 %v11206_v32 }
 0x219   :  { %9561 = vmatpush3.bf16.msra.mxu0 %v11364_v21  ;;  %9628 = vmatprep.subr.bf16.mxu1 %v12291_v7 }
 0x21a   :  { %9562 = vmatprep.subr.bf16.mxu0 %v12291_v7 }
 0x21b   :  { %8550 = vmatmul.mubr.f32.vlgmr.msra.gmra.mrb[8].mxu1 %v10656_v35  ;;  %v11401_v35 = vpack.c.bf16 %v12325_v59, %v12324_v63  ;;  %v158_v63 = vsel %vm157_vm4, %v156_v43, 0.0 }
 0x21c   :  { %9630 = vmatpush3.bf16.msra.mxu1 %v11374_v16  ;;  %8568 = vmatprep.mubr.msk.f32.mxu1 %vm10398_vm0, %v12296_v14 }
 0x21d   :  { %9564 = vmatpush3.bf16.msra.mxu0 %v11382_v28  ;;  %9631 = vmatprep.subr.bf16.mxu1 %v12291_v7  ;;  %12326 = vst [vmem:[#allocation50_spill] sm:$0xff] %v11401_v35  ;;  %v7512_v28 = vld [vmem:[#allocation10] ss:$0 sm:$0xff] }
 0x21e   :  { %9565 = vmatprep.subr.bf16.mxu0 %v12291_v7  ;;  %159 = vadd.xlane.f32.xlu0 %v158_v63 }
 0x220   :  { %9633 = vmatpush3.bf16.msra.mxu1 %v11391_v57 }
 0x221   :  { %9567 = vmatpush3.bf16.msra.mxu0 %v11401_v35  ;;  %9634 = vmatprep.subr.bf16.mxu1 %v12291_v7 }
 0x222   :  { %9568 = vmatprep.subr.bf16.mxu0 %v12291_v7  ;;  %164 = vadd.xlane.f32.xlu0 %v163_v4 }
 0x224   :  { %8455 = vmatmul.mubr.f32.vlgmr.msra.gmra.mrb[8].mxu0 %v10634_v22  ;;  %9636 = vmatpush3.bf16.msra.mxu1 %v11409_v47 }
 0x225   :  { %9570 = vmatpush3.bf16.msra.mxu0 %v11053_v33  ;;  %9637 = vmatprep.subr.bf16.mxu1 %v12291_v7 }
 0x226   :  { %9571 = vmatprep.subr.bf16.mxu0 %v12291_v7  ;;  %8473 = vmatprep.mubr.msk.f32.mxu0 %vm10398_vm0, %v12296_v14 }
 0x228   :  { %9639 = vmatpush3.bf16.msra.mxu1 %v11420_v8  ;;  %v11458_v8 = vpop.permute.xlu1 %170 }
 0x229   :  { %9573 = vmatpush3.bf16.msra.mxu0 %v11092_v58  ;;  %9640 = vmatprep.subr.bf16.mxu1 %v12291_v7  ;;  %12335 = vst [vmem:[#allocation53_spill] sm:$0xff] %v11458_v8  ;;  %v788_v57 = vmul.f32 %v11100_v31, %v11458_v8 }
 0x22a   :  { %9574 = vmatprep.subr.bf16.mxu0 %v12291_v7 }
 0x22b   :  { %8569 = vmatmul.mubr.f32.vlgmr.msra.gmra.mrb[8].mxu1 %v10634_v22 }
 0x22c   :  { %9642 = vmatpush3.bf16.msra.mxu1 %v11119_v27  ;;  %8587 = vmatprep.mubr.msk.f32.mxu1 %vm10398_vm0, %v12296_v14 }
 0x22d   :  { %9576 = vmatpush3.bf16.msra.mxu0 %v11126_v26  ;;  %9643 = vmatprep.subr.bf16.mxu1 %v12291_v7 }
 0x22e   :  { %9577 = vmatprep.subr.bf16.mxu0 %v12291_v7 }
 0x230   :  { %9645 = vmatpush3.bf16.msra.mxu1 %v11141_v18 }
 0x231   :  { %9579 = vmatpush3.bf16.msra.mxu0 %v11139_v60  ;;  %9646 = vmatprep.subr.bf16.mxu1 %v12291_v7 }
 0x232   :  { %8590 = vmatprep.subr.mxu0 %v12296_v14 }
 0x234   :  { %8474 = vmatmul.mubr.f32.vlgmr.msra.gmra.mrb[8].mxu0 %v10634_v22  ;;  %9648 = vmatpush3.bf16.msra.mxu1 %v11188_v51 }
 0x235   :  { %9649 = vmatprep.subr.bf16.mxu1 %v12291_v7  ;;  %8592 = vmatprep.mubr.msk.f32.mxu0 %vm10398_vm0, %v12296_v14 }
 0x238   :  { %9651 = vmatpush3.bf16.msra.mxu1 %v11206_v32 }
 0x239   :  { %8595 = vmatprep.subr.mxu1 %v12296_v14 }
 0x23b   :  { %8588 = vmatmul.mubr.f32.vlgmr.msra.gmra.mrb[8].mxu1 %v10634_v22 }
 0x23c   :  { %8597 = vmatprep.mubr.msk.f32.mxu1 %vm10398_vm0, %v12296_v14 }
 0x29e   :  { %v1406_v13 = vpop.f32.mrb[2].mxu0 }
 0x29f   :  { %v8336_v50 = vpop.f32.mrb[3].mxu0 }
 0x2a2   :  { %v1556_v29 = vpop.f32.mrb[4].mxu0 }
 0x2a3   :  { %v8346_v40 = vpop.f32.mrb[5].mxu0 }
 0x2a6   :  { %v1482_v22 = vpop.f32.mrb[2].mxu1 }
 0x2a7   :  { %v1483_v59 = vadd.f32 %v1482_v22, %v1406_v13  ;;  %v8341_v54 = vpop.f32.mrb[3].mxu1  ;;  %v1704_v1 = vpop.f32.mrb[6].mxu0  ;;  %v214_v22 = vld [vmem:[%s12193_s5] sm:$0x3f] }
 0x2a8   :  { %v8356_v45 = vpop.f32.mrb[7].mxu0 }
 0x2a9   :  { %v1557_v50 = vadd.f32 %v1556_v29, %v1483_v59  ;;  %v2858_v29 = vsel %vm1326_vm2, %v214_v22, 0 }
 0x2aa   :  { %v1630_v40 = vpop.f32.mrb[4].mxu1  ;;  %v11466_v25 = vand.u32 4294901760, %v2858_v29 }
 0x2ab   :  { %v1631_v47 = vadd.f32 %v1630_v40, %v1557_v50  ;;  %v8351_v35 = vpop.f32.mrb[5].mxu1 }
 0x2ac   :  { %12336 = vst [vmem:[#allocation54_spill] sm:$0xff] %v11466_v25  ;;  %v11469_v63 = vsub.f32 %v2858_v29, %v11466_v25  ;;  %v11471_v35 = vpop.permute.xlu1 %184 }
 0x2ad   :  { %v1705_v36 = vadd.f32 %v1704_v1, %v1631_v47  ;;  %12338 = vst [vmem:[#allocation56_spill] sm:$0xff] %v11471_v35 }
 0x2ae   :  { %v1776_v30 = vpop.f32.mrb[6].mxu1  ;;  %12337 = vst [vmem:[#allocation55_spill] sm:$0xff] %v11469_v63  ;;  %v11474_v31 = vand.u32 4294901760, %v11469_v63 }
 0x2af   :  { %v1777_v3 = vadd.f32 %v1776_v30, %v1705_v36  ;;  %v8361_v43 = vpop.f32.mrb[7].mxu1 }
 0x2b0   :  { %12339 = vst [vmem:[#allocation57_spill] sm:$0xff] %v11474_v31  ;;  %v2932_v1 = vsub.f32 %v11469_v63, %v11474_v31 }
 0x2b1   :  { %v1780_v13 = vadd.f32 %v1777_v3, %v788_v57 }
 0x2b2   :  { %v11482_v40 = vand.u32 4294901760, %v2932_v1 }
 0x2b4   :  { %12340 = vst [vmem:[#allocation58_spill] sm:$0xff] %v11482_v40 }
 0x307   :  { %v2314_v47 = vpop.f32.mrb[8].mxu0 }
 0x308   :  { %v2318_v59 = vmul.f32 %v2314_v47, %v11471_v35  ;;  %v8475_v57 = vpop.f32.mrb[9].mxu0  ;;  %v7509_v47 = vld [vmem:[#allocation5] ss:$0 sm:$0xff] }
 0x30a   :  { %v11477_v54 = vadd.f32 %v2318_v59, %v1780_v13  ;;  %v7510_v59 = vld [vmem:[#allocation7] ss:$0 sm:$0xff] }
 0x30e   :  { %v2853_v45 = vpop.f32.mrb[8].mxu1 }
 0x30f   :  { %v2861_v4 = vsel %vm1330_vm3, %v2853_v45, 0  ;;  %v8589_v50 = vpop.f32.mrb[9].mxu1  ;;  %v160_v45 = vpop.xlane.xlu0 %159 }
 0x310   :  { %v2864_v36 = vand.u32 4294901760, %v2861_v4  ;;  %v193_v50 = vmul.f32 %v7510_v59, %v11471_v35 }
 0x312   :  { %v2941_v30 = vsub.f32 %v2861_v4, %v2864_v36  ;;  %8591 = vmatpush3.msra.mxu0 %v2864_v36  ;;  %v179_v4 = vmul.f32 %v7509_v47, %v11458_v8 }
 0x313   :  { %8593 = vmatmul.mubr.f32.vlgmr.msra.gmra.mrb[10].mxu0 %v11482_v40  ;;  %8600 = vmatprep.subr.mxu0 %v12296_v14 }
 0x314   :  { %v2942_v3 = vand.u32 4294901760, %v2941_v30  ;;  %8601 = vmatpush3.msra.mxu0 %v2941_v30  ;;  %8602 = vmatprep.mubr.msk.f32.mxu0 %vm10398_vm0, %v12296_v14 }
 0x315   :  { %8610 = vmatprep.subr.mxu0 %v12296_v14 }
 0x316   :  { %v2943_v43 = vsub.f32 %v2941_v30, %v2942_v3 }
 0x317   :  { %8603 = vmatmul.mubr.f32.vlgmr.msra.gmra.mrb[12].mxu0 %v11469_v63 }
 0x318   :  { %v2944_v13 = vand.u32 4294901760, %v2943_v43  ;;  %8611 = vmatpush3.msra.mxu0 %v2942_v3  ;;  %8612 = vmatprep.mubr.msk.f32.mxu0 %vm10398_vm0, %v12296_v14 }
 0x319   :  { %9652 = vmatprep.subr.bf16.mxu0 %v12291_v7 }
 0x31a   :  { %8596 = vmatpush3.msra.mxu1 %v2944_v13 }
 0x31b   :  { %8598 = vmatmul.mubr.f32.vlgmr.msra.gmra.mrb[10].mxu1 %v11466_v25  ;;  %8605 = vmatprep.subr.mxu1 %v12296_v14 }
 0x31c   :  { %8606 = vmatpush3.msra.mxu1 %v2864_v36  ;;  %8607 = vmatprep.mubr.msk.f32.mxu1 %vm10398_vm0, %v12296_v14 }
 0x31d   :  { %8615 = vmatprep.subr.mxu1 %v12296_v14  ;;  %8613 = vmatmul.mubr.f32.vlgmr.msra.gmra.mrb[14].mxu0 %v11466_v25 }
 0x31e   :  { %9654 = vmatpush3.bf16.msra.mxu0 %v10718_v6  ;;  %8636 = vmatprep.mubr.msk.f32.mxu0 %vm10398_vm0, %v12296_v14 }
 0x31f   :  { %8608 = vmatmul.mubr.f32.vlgmr.msra.gmra.mrb[12].mxu1 %v11474_v31  ;;  %9655 = vmatprep.subr.bf16.mxu0 %v12291_v7  ;;  %v194_v31 = vadd.f32 %v193_v50, %v179_v4  ;;  %v12355_v50 = vld [vmem:[#allocation36_spill] sm:$0xff] }
 0x320   :  { %8616 = vmatpush3.msra.mxu1 %v2864_v36  ;;  %8617 = vmatprep.mubr.msk.f32.mxu1 %vm10398_vm0, %v12296_v14  ;;  %v7511_v36 = vld [vmem:[#allocation8] ss:$0 sm:$0xff] }
 0x321   :  { %9724 = vmatprep.subr.bf16.mxu1 %v12291_v7 }
 0x322   :  { %9657 = vmatpush3.bf16.msra.mxu0 %v10734_v17 }
 0x323   :  { %8618 = vmatmul.mubr.f32.vlgmr.msra.gmra.mrb[14].mxu1 %v11466_v25  ;;  %9658 = vmatprep.subr.bf16.mxu0 %v12291_v7  ;;  %v202_v25 = vmul.f32 %v7511_v36, %v160_v45  ;;  %v12356_v36 = vld [vmem:[#allocation32_spill] sm:$0xff] }
 0x324   :  { %9726 = vmatpush3.bf16.msra.mxu1 %v10615_v12  ;;  %8750 = vmatprep.mubr.msk.f32.mxu1 %vm10398_vm0, %v12296_v14 }
 0x325   :  { %9727 = vmatprep.subr.bf16.mxu1 %v12291_v7 }
 0x326   :  { %9660 = vmatpush3.bf16.msra.mxu0 %v10750_v42 }
 0x327   :  { %9661 = vmatprep.subr.bf16.mxu0 %v12291_v7 }
 0x328   :  { %9729 = vmatpush3.bf16.msra.mxu1 %v10626_v19 }
 0x329   :  { %9730 = vmatprep.subr.bf16.mxu1 %v12291_v7 }
 0x32a   :  { %9663 = vmatpush3.bf16.msra.mxu0 %v10770_v55 }
 0x32b   :  { %9664 = vmatprep.subr.bf16.mxu0 %v12291_v7 }
 0x32c   :  { %9732 = vmatpush3.bf16.msra.mxu1 %v10653_v34 }
 0x32d   :  { %9733 = vmatprep.subr.bf16.mxu1 %v12291_v7 }
 0x330   :  { %9735 = vmatpush3.bf16.msra.mxu1 %v10678_v44 }
 0x331   :  { %9736 = vmatprep.subr.bf16.mxu1 %v12291_v7 }
 0x3e6   :  { %v2935_v22 = vpop.f32.mrb[10].mxu0 }
 0x3e7   :  { %v8594_v29 = vpop.f32.mrb[11].mxu0 }
 0x3e8   :  { %v165_v29 = vpop.xlane.xlu0 %164 }
 0x3e9   :  { %v211_v53 = vmul.f32 %v7512_v28, %v165_v29  ;;  %v12349_v28 = vld [vmem:[#allocation29_spill] sm:$0xff]  ;;  %v12360_v29 = vld [vmem:[#allocation39_spill] sm:$0xff] }
 0x3ea   :  { %v3085_v57 = vpop.f32.mrb[12].mxu0 }
 0x3eb   :  { %v8604_v1 = vpop.f32.mrb[13].mxu0 }
 0x3ec   :  { %v203_v1 = vadd.f32 %v202_v25, %v194_v31  ;;  %v12351_v25 = vld [vmem:[#allocation34_spill] sm:$0xff]  ;;  %v12353_v31 = vld [vmem:[#allocation35_spill] sm:$0xff] }
 0x3ee   :  { %v3011_v30 = vpop.f32.mrb[10].mxu1  ;;  %v11526_v35 = vadd.f32 %v211_v53, %v203_v1  ;;  %v12347_v53 = vld [vmem:[#allocation28_spill] sm:$0xff] }
 0x3ef   :  { %v3012_v3 = vadd.f32 %v3011_v30, %v2935_v22  ;;  %v8599_v43 = vpop.f32.mrb[11].mxu1  ;;  %v12357_v30 = vld [vmem:[#allocation37_spill] sm:$0xff] }
 0x3f0   :  { %v3233_v13 = vpop.f32.mrb[14].mxu0 }
 0x3f1   :  { %v3086_v63 = vadd.f32 %v3085_v57, %v3012_v3  ;;  %v8614_v40 = vpop.f32.mrb[15].mxu0  ;;  %v12358_v3 = vld [vmem:[#allocation33_spill] sm:$0xff] }
 0x3f2   :  { %v3159_v16 = vpop.f32.mrb[12].mxu1 }
 0x3f3   :  { %v3160_v21 = vadd.f32 %v3159_v16, %v3086_v63  ;;  %v8609_v46 = vpop.f32.mrb[13].mxu1  ;;  %v12348_v16 = vld [vmem:[#allocation23_spill] sm:$0xff]  ;;  %v12352_v63 = vld [vmem:[#allocation30_spill] sm:$0xff] }
 0x3f5   :  { %v3234_v24 = vadd.f32 %v3233_v13, %v3160_v21 }
 0x3f6   :  { %v3305_v47 = vpop.f32.mrb[14].mxu1 }
 0x3f7   :  { %v3306_v8 = vadd.f32 %v3305_v47, %v3234_v24  ;;  %v8619_v59 = vpop.f32.mrb[15].mxu1  ;;  %v12361_v47 = vld [vmem:[#allocation38_spill] sm:$0xff] }
 0x3f8   :  { %v12362_v59 = vld [vmem:[#allocation40_spill] sm:$0xff] }
 0x3f9   :  { %v3309_v22 = vadd.f32 %v3306_v8, %v11477_v54  ;;  %v12350_v8 = vld [vmem:[#allocation25_spill] sm:$0xff]  ;;  %v12354_v54 = vld [vmem:[#allocation31_spill] sm:$0xff] }
 0x3fb   :  { %v3310_v4 = vadd.f32 %v3309_v22, %v11526_v35  ;;  %v12363_v22 = vld [vmem:[#allocation42_spill] sm:$0xff] }
 0x3fd   :  { %v3312_v57 = vsel %vm247_vm1, %v3310_v4, 0 }
 0x3fe   :  { %v11531_v40 = vand.u32 4294901760, %v3312_v57 }
 0x400   :  { %v11534_v45 = vsub.f32 %v3312_v57, %v11531_v40 }
 0x402   :  { %v11537_v46 = vand.u32 4294901760, %v11534_v45 }
 0x404   :  { %v3390_v21 = vsub.f32 %v11534_v45, %v11537_v46 }
 0x406   :  { %v11541_v24 = vand.u32 4294901760, %v3390_v21  ;;  %v12374_v21 = vld [vmem:[#allocation53_spill] sm:$0xff] }
 0x408   :  { %8637 = vmatmul.mubr.f32.vlgmr.msra.gmra.mrb[16].mxu0 %v11541_v24  ;;  %8751 = vmatmul.mubr.f32.vlgmr.msra.gmra.mrb[16].mxu1 %v11541_v24 }
 0x409   :  { %9666 = vmatpush3.bf16.msra.mxu0 %v10796_v10  ;;  %9738 = vmatpush3.bf16.msra.mxu1 %v10711_v62  ;;  %v12341_v62 = vld [vmem:[#allocation24_spill] sm:$0xff] }
 0x40a   :  { %9667 = vmatprep.subr.bf16.mxu0 %v12291_v7  ;;  %9739 = vmatprep.subr.bf16.mxu1 %v12291_v7  ;;  %v12342_v10 = vld [vmem:[#allocation20_spill] sm:$0xff] }
 0x40b   :  { %8655 = vmatprep.mubr.msk.f32.mxu0 %vm10398_vm0, %v12296_v14  ;;  %8769 = vmatprep.mubr.msk.f32.mxu1 %vm10398_vm0, %v12296_v14 }
 0x40d   :  { %9669 = vmatpush3.bf16.msra.mxu0 %v10814_v48  ;;  %9741 = vmatpush3.bf16.msra.mxu1 %v10731_v15  ;;  %v12343_v15 = vld [vmem:[#allocation26_spill] sm:$0xff]  ;;  %v12344_v48 = vld [vmem:[#allocation21_spill] sm:$0xff] }
 0x40e   :  { %9670 = vmatprep.subr.bf16.mxu0 %v12291_v7  ;;  %9742 = vmatprep.subr.bf16.mxu1 %v12291_v7 }
 0x411   :  { %9672 = vmatpush3.bf16.msra.mxu0 %v10831_v2  ;;  %9744 = vmatpush3.bf16.msra.mxu1 %v10766_v52  ;;  %v12345_v52 = vld [vmem:[#allocation27_spill] sm:$0xff]  ;;  %v12346_v2 = vld [vmem:[#allocation22_spill] sm:$0xff] }
 0x412   :  { %9673 = vmatprep.subr.bf16.mxu0 %v12291_v7  ;;  %9745 = vmatprep.subr.bf16.mxu1 %v12291_v7 }
 0x415   :  { %9675 = vmatpush3.bf16.msra.mxu0 %v12341_v62  ;;  %9747 = vmatpush3.bf16.msra.mxu1 %v12342_v10 }
 0x416   :  { %9676 = vmatprep.subr.bf16.mxu0 %v12291_v7  ;;  %9748 = vmatprep.subr.bf16.mxu1 %v12291_v7 }
 0x418   :  { %8656 = vmatmul.mubr.f32.vlgmr.msra.gmra.mrb[16].mxu0 %v11531_v40  ;;  %8770 = vmatmul.mubr.f32.vlgmr.msra.gmra.mrb[16].mxu1 %v11531_v40 }
 0x419   :  { %9678 = vmatpush3.bf16.msra.mxu0 %v12343_v15  ;;  %9750 = vmatpush3.bf16.msra.mxu1 %v12344_v48  ;;  %v12375_v48 = vld [vmem:[#allocation56_spill] sm:$0xff] }
 0x41a   :  { %9679 = vmatprep.subr.bf16.mxu0 %v12291_v7  ;;  %9751 = vmatprep.subr.bf16.mxu1 %v12291_v7 }
 0x41b   :  { %8674 = vmatprep.mubr.msk.f32.mxu0 %vm10398_vm0, %v12296_v14  ;;  %8788 = vmatprep.mubr.msk.f32.mxu1 %vm10398_vm0, %v12296_v14 }
 0x41d   :  { %9681 = vmatpush3.bf16.msra.mxu0 %v12345_v52  ;;  %9753 = vmatpush3.bf16.msra.mxu1 %v12346_v2 }
 0x41e   :  { %9682 = vmatprep.subr.bf16.mxu0 %v12291_v7  ;;  %9754 = vmatprep.subr.bf16.mxu1 %v12291_v7 }
 0x421   :  { %9684 = vmatpush3.bf16.msra.mxu0 %v12347_v53  ;;  %9756 = vmatpush3.bf16.msra.mxu1 %v12348_v16 }
 0x422   :  { %9685 = vmatprep.subr.bf16.mxu0 %v12291_v7  ;;  %9757 = vmatprep.subr.bf16.mxu1 %v12291_v7 }
 0x425   :  { %9687 = vmatpush3.bf16.msra.mxu0 %v12349_v28  ;;  %9759 = vmatpush3.bf16.msra.mxu1 %v12350_v8 }
 0x426   :  { %9688 = vmatprep.subr.bf16.mxu0 %v12291_v7  ;;  %9760 = vmatprep.subr.bf16.mxu1 %v12291_v7 }
 0x428   :  { %8675 = vmatmul.mubr.f32.vlgmr.msra.gmra.mrb[16].mxu0 %v11534_v45  ;;  %8789 = vmatmul.mubr.f32.vlgmr.msra.gmra.mrb[16].mxu1 %v11534_v45 }
 0x429   :  { %9690 = vmatpush3.bf16.msra.mxu0 %v10718_v6  ;;  %9762 = vmatpush3.bf16.msra.mxu1 %v10615_v12 }
 0x42a   :  { %9691 = vmatprep.subr.bf16.mxu0 %v12291_v7  ;;  %9763 = vmatprep.subr.bf16.mxu1 %v12291_v7 }
 0x42b   :  { %8693 = vmatprep.mubr.msk.f32.mxu0 %vm10398_vm0, %v12296_v14  ;;  %8807 = vmatprep.mubr.msk.f32.mxu1 %vm10398_vm0, %v12296_v14 }
 0x42d   :  { %9693 = vmatpush3.bf16.msra.mxu0 %v10734_v17  ;;  %9765 = vmatpush3.bf16.msra.mxu1 %v10626_v19 }
 0x42e   :  { %9694 = vmatprep.subr.bf16.mxu0 %v12291_v7  ;;  %9766 = vmatprep.subr.bf16.mxu1 %v12291_v7 }
 0x431   :  { %9696 = vmatpush3.bf16.msra.mxu0 %v10750_v42  ;;  %9768 = vmatpush3.bf16.msra.mxu1 %v10653_v34 }
 0x432   :  { %9697 = vmatprep.subr.bf16.mxu0 %v12291_v7  ;;  %9769 = vmatprep.subr.bf16.mxu1 %v12291_v7 }
 0x435   :  { %9699 = vmatpush3.bf16.msra.mxu0 %v10770_v55  ;;  %9771 = vmatpush3.bf16.msra.mxu1 %v10678_v44 }
 0x436   :  { %9700 = vmatprep.subr.bf16.mxu0 %v12291_v7  ;;  %9772 = vmatprep.subr.bf16.mxu1 %v12291_v7 }
 0x438   :  { %8694 = vmatmul.mubr.f32.vlgmr.msra.gmra.mrb[16].mxu0 %v11537_v46  ;;  %8808 = vmatmul.mubr.f32.vlgmr.msra.gmra.mrb[16].mxu1 %v11537_v46 }
 0x439   :  { %9702 = vmatpush3.bf16.msra.mxu0 %v12351_v25  ;;  %9774 = vmatpush3.bf16.msra.mxu1 %v12352_v63 }
 0x43a   :  { %9703 = vmatprep.subr.bf16.mxu0 %v12291_v7  ;;  %9775 = vmatprep.subr.bf16.mxu1 %v12291_v7 }
 0x43b   :  { %8712 = vmatprep.mubr.msk.f32.mxu0 %vm10398_vm0, %v12296_v14  ;;  %8826 = vmatprep.mubr.msk.f32.mxu1 %vm10398_vm0, %v12296_v14 }
 0x43d   :  { %9705 = vmatpush3.bf16.msra.mxu0 %v12353_v31  ;;  %9777 = vmatpush3.bf16.msra.mxu1 %v12354_v54  ;;  %v12376_v31 = vld [vmem:[#allocation58_spill] sm:$0xff] }
 0x43e   :  { %9706 = vmatprep.subr.bf16.mxu0 %v12291_v7  ;;  %9778 = vmatprep.subr.bf16.mxu1 %v12291_v7 }
 0x441   :  { %9708 = vmatpush3.bf16.msra.mxu0 %v12355_v50  ;;  %9780 = vmatpush3.bf16.msra.mxu1 %v12356_v36  ;;  %v12377_v36 = vld [vmem:[#allocation55_spill] sm:$0xff] }
 0x442   :  { %9709 = vmatprep.subr.bf16.mxu0 %v12291_v7  ;;  %9781 = vmatprep.subr.bf16.mxu1 %v12291_v7 }
 0x445   :  { %9711 = vmatpush3.bf16.msra.mxu0 %v12357_v30  ;;  %9783 = vmatpush3.bf16.msra.mxu1 %v12358_v3  ;;  %v12378_v3 = vld [vmem:[#allocation54_spill] sm:$0xff] }
 0x446   :  { %9712 = vmatprep.subr.bf16.mxu0 %v12291_v7  ;;  %9784 = vmatprep.subr.bf16.mxu1 %v12291_v7 }
 0x448   :  { %8713 = vmatmul.mubr.f32.vlgmr.msra.gmra.mrb[16].mxu0 %v11531_v40  ;;  %8827 = vmatmul.mubr.f32.vlgmr.msra.gmra.mrb[16].mxu1 %v11531_v40 }
 0x449   :  { %9714 = vmatpush3.bf16.msra.mxu0 %v10718_v6  ;;  %9786 = vmatpush3.bf16.msra.mxu1 %v10615_v12 }
 0x44a   :  { %9715 = vmatprep.subr.bf16.mxu0 %v12291_v7  ;;  %9787 = vmatprep.subr.bf16.mxu1 %v12291_v7 }
 0x44b   :  { %8731 = vmatprep.mubr.msk.f32.mxu0 %vm10398_vm0, %v12296_v14  ;;  %8845 = vmatprep.mubr.msk.f32.mxu1 %vm10398_vm0, %v12296_v14 }
 0x44d   :  { %9717 = vmatpush3.bf16.msra.mxu0 %v10734_v17  ;;  %9789 = vmatpush3.bf16.msra.mxu1 %v10626_v19 }
 0x44e   :  { %9718 = vmatprep.subr.bf16.mxu0 %v12291_v7  ;;  %9790 = vmatprep.subr.bf16.mxu1 %v12291_v7 }
 0x451   :  { %9720 = vmatpush3.bf16.msra.mxu0 %v10750_v42  ;;  %9792 = vmatpush3.bf16.msra.mxu1 %v10653_v34 }
 0x452   :  { %9721 = vmatprep.subr.bf16.mxu0 %v12291_v7  ;;  %9793 = vmatprep.subr.bf16.mxu1 %v12291_v7 }
 0x455   :  { %9723 = vmatpush3.bf16.msra.mxu0 %v10770_v55  ;;  %9795 = vmatpush3.bf16.msra.mxu1 %v10678_v44  ;;  %v12359_v55 = vld [vmem:[#allocation41_spill] sm:$0xff] }
 0x456   :  { %8848 = vmatprep.subr.mxu0 %v12296_v14  ;;  %8853 = vmatprep.subr.mxu1 %v12296_v14 }
 0x458   :  { %8732 = vmatmul.mubr.f32.vlgmr.msra.gmra.mrb[16].mxu0 %v11531_v40  ;;  %8846 = vmatmul.mubr.f32.vlgmr.msra.gmra.mrb[16].mxu1 %v11531_v40 }
 0x459   :  { %8850 = vmatprep.mubr.msk.f32.mxu0 %vm10398_vm0, %v12296_v14  ;;  %8855 = vmatprep.mubr.msk.f32.mxu1 %vm10398_vm0, %v12296_v14 }
 0x52b   :  { %v11659_v12 = vpop.f32.mrb[16].mxu0  ;;  %v4385_v19 = vpop.f32.mrb[16].mxu1 }
 0x52c   :  { %v4390_v34 = vsel %vm1330_vm3, %v4385_v19, 0  ;;  %v8733_v44 = vpop.f32.mrb[17].mxu0  ;;  %v8847_v6 = vpop.f32.mrb[17].mxu1  ;;  %v6366_v19 = vld [vmem:[%s12204_s16] sm:$0xff] }
 0x52d   :  { %v4393_v17 = vand.u32 4294901760, %v4390_v34  ;;  %v6927_v44 = vld [vmem:[%s12206_s18] sm:$0xff]  ;;  %v6385_v6 = vand.u32 4294901760, %v6366_v19 }
 0x52f   :  { %v4470_v42 = vsub.f32 %v4390_v34, %v4393_v17  ;;  %8849 = vmatpush3.msra.mxu0 %v4393_v17  ;;  %v6367_v34 = vld [vmem:[%s12204_s16 + $0x8] sm:$0xff] }
 0x530   :  { %8851 = vmatmul.mubr.f32.vlgmr.msra.gmra.mrb[18].mxu0 %v12359_v55  ;;  %8858 = vmatprep.subr.mxu0 %v12296_v14  ;;  %v6943_v55 = vand.u32 4294901760, %v6927_v44 }
 0x531   :  { %v4471_v43 = vand.u32 4294901760, %v4470_v42  ;;  %8859 = vmatpush3.msra.mxu0 %v4470_v42  ;;  %8860 = vmatprep.mubr.msk.f32.mxu0 %vm10398_vm0, %v12296_v14 }
 0x532   :  { %8868 = vmatprep.subr.mxu0 %v12296_v14 }
 0x533   :  { %v4472_v13 = vsub.f32 %v4470_v42, %v4471_v43  ;;  %v6928_v42 = vld [vmem:[%s12206_s18 + $0x8] sm:$0xff] }
 0x534   :  { %8861 = vmatmul.mubr.f32.vlgmr.msra.gmra.mrb[20].mxu0 %v12360_v29 }
 0x535   :  { %v4473_v1 = vand.u32 4294901760, %v4472_v13  ;;  %8869 = vmatpush3.msra.mxu0 %v4471_v43  ;;  %8870 = vmatprep.mubr.msk.f32.mxu0 %vm10398_vm0, %v12296_v14  ;;  %v6946_v43 = vand.u32 4294901760, %v6928_v42 }
 0x536   :  { %9796 = vmatprep.subr.bf16.mxu0 %v12291_v7 }
 0x537   :  { %8854 = vmatpush3.msra.mxu1 %v4473_v1  ;;  %v11862_v29 = vpack.c.bf16 %v6946_v43, %v6943_v55  ;;  %v6368_v1 = vld [vmem:[%s12204_s16 + $0x10] sm:$0xff] }
 0x538   :  { %8856 = vmatmul.mubr.f32.vlgmr.msra.gmra.mrb[18].mxu1 %v12361_v47  ;;  %8863 = vmatprep.subr.mxu1 %v12296_v14 }
 0x539   :  { %8871 = vmatmul.mubr.f32.vlgmr.msra.gmra.mrb[22].mxu0 %v12361_v47  ;;  %8864 = vmatpush3.msra.mxu1 %v4393_v17 }
 0x53a   :  { %9798 = vmatpush3.bf16.msra.mxu0 %v11053_v33  ;;  %8865 = vmatprep.mubr.msk.f32.mxu1 %vm10398_vm0, %v12296_v14 }
 0x53b   :  { %8873 = vmatprep.subr.mxu1 %v12296_v14  ;;  %9799 = vmatprep.subr.bf16.mxu0 %v12291_v7 }
 0x53c   :  { %8866 = vmatmul.mubr.f32.vlgmr.msra.gmra.mrb[20].mxu1 %v12362_v59  ;;  %8894 = vmatprep.mubr.msk.f32.mxu0 %vm10398_vm0, %v12296_v14  ;;  %v6929_v59 = vld [vmem:[%s12206_s18 + $0x10] sm:$0xff] }
 0x53d   :  { %8874 = vmatpush3.msra.mxu1 %v4393_v17  ;;  %8875 = vmatprep.mubr.msk.f32.mxu1 %vm10398_vm0, %v12296_v14  ;;  %v6388_v17 = vand.u32 4294901760, %v6367_v34 }
 0x53e   :  { %9801 = vmatpush3.bf16.msra.mxu0 %v11092_v58  ;;  %9868 = vmatprep.subr.bf16.mxu1 %v12291_v7 }
 0x53f   :  { %9802 = vmatprep.subr.bf16.mxu0 %v12291_v7  ;;  %v11860_v13 = vpack.c.bf16 %v6388_v17, %v6385_v6 }
 0x540   :  { %8876 = vmatmul.mubr.f32.vlgmr.msra.gmra.mrb[22].mxu1 %v12361_v47  ;;  %v6369_v47 = vld [vmem:[%s12204_s16 + $0x18] sm:$0xff] }
 0x541   :  { %9870 = vmatpush3.bf16.msra.mxu1 %v11119_v27  ;;  %9008 = vmatprep.mubr.msk.f32.mxu1 %vm10398_vm0, %v12296_v14 }
 0x542   :  { %9804 = vmatpush3.bf16.msra.mxu0 %v11126_v26  ;;  %9871 = vmatprep.subr.bf16.mxu1 %v12291_v7 }
 0x543   :  { %9805 = vmatprep.subr.bf16.mxu0 %v12291_v7 }
 0x545   :  { %9873 = vmatpush3.bf16.msra.mxu1 %v11141_v18 }
 0x546   :  { %9807 = vmatpush3.bf16.msra.mxu0 %v11139_v60  ;;  %9874 = vmatprep.subr.bf16.mxu1 %v12291_v7 }
 0x547   :  { %9808 = vmatprep.subr.bf16.mxu0 %v12291_v7 }
 0x549   :  { %8895 = vmatmul.mubr.f32.vlgmr.msra.gmra.mrb[24].mxu0 %v11541_v24  ;;  %9876 = vmatpush3.bf16.msra.mxu1 %v11188_v51 }
 0x54a   :  { %9810 = vmatpush3.bf16.msra.mxu0 %v11186_v20  ;;  %9877 = vmatprep.subr.bf16.mxu1 %v12291_v7  ;;  %v12364_v20 = vld [vmem:[#allocation43_spill] sm:$0xff] }
 0x54b   :  { %9811 = vmatprep.subr.bf16.mxu0 %v12291_v7  ;;  %8913 = vmatprep.mubr.msk.f32.mxu0 %vm10398_vm0, %v12296_v14 }
 0x54d   :  { %9879 = vmatpush3.bf16.msra.mxu1 %v11206_v32 }
 0x54e   :  { %9813 = vmatpush3.bf16.msra.mxu0 %v12363_v22  ;;  %9880 = vmatprep.subr.bf16.mxu1 %v12291_v7  ;;  %v6391_v22 = vand.u32 4294901760, %v6368_v1 }
 0x54f   :  { %9814 = vmatprep.subr.bf16.mxu0 %v12291_v7 }
 0x550   :  { %9009 = vmatmul.mubr.f32.vlgmr.msra.gmra.mrb[24].mxu1 %v11541_v24 }
 0x551   :  { %9882 = vmatpush3.bf16.msra.mxu1 %v11233_v0  ;;  %9027 = vmatprep.mubr.msk.f32.mxu1 %vm10398_vm0, %v12296_v14  ;;  %v12365_v0 = vld [vmem:[#allocation44_spill] sm:$0xff] }
 0x552   :  { %9816 = vmatpush3.bf16.msra.mxu0 %v11246_v37  ;;  %9883 = vmatprep.subr.bf16.mxu1 %v12291_v7  ;;  %v12366_v37 = vld [vmem:[#allocation45_spill] sm:$0xff] }
 0x553   :  { %9817 = vmatprep.subr.bf16.mxu0 %v12291_v7 }
 0x555   :  { %9885 = vmatpush3.bf16.msra.mxu1 %v11251_v23  ;;  %v12367_v23 = vld [vmem:[#allocation46_spill] sm:$0xff] }
 0x556   :  { %9819 = vmatpush3.bf16.msra.mxu0 %v11263_v56  ;;  %9886 = vmatprep.subr.bf16.mxu1 %v12291_v7  ;;  %v12368_v56 = vld [vmem:[#allocation47_spill] sm:$0xff] }
 0x557   :  { %9820 = vmatprep.subr.bf16.mxu0 %v12291_v7 }
 0x559   :  { %8914 = vmatmul.mubr.f32.vlgmr.msra.gmra.mrb[24].mxu0 %v11531_v40  ;;  %9888 = vmatpush3.bf16.msra.mxu1 %v11267_v5  ;;  %v12369_v5 = vld [vmem:[#allocation48_spill] sm:$0xff] }
 0x55a   :  { %9822 = vmatpush3.bf16.msra.mxu0 %v11273_v39  ;;  %9889 = vmatprep.subr.bf16.mxu1 %v12291_v7  ;;  %v12370_v39 = vld [vmem:[#allocation49_spill] sm:$0xff] }
 0x55b   :  { %9823 = vmatprep.subr.bf16.mxu0 %v12291_v7  ;;  %8932 = vmatprep.mubr.msk.f32.mxu0 %vm10398_vm0, %v12296_v14 }
 0x55d   :  { %9891 = vmatpush3.bf16.msra.mxu1 %v11278_v11  ;;  %v12371_v11 = vld [vmem:[#allocation50_spill] sm:$0xff] }
 0x55e   :  { %9825 = vmatpush3.bf16.msra.mxu0 %v11284_v38  ;;  %9892 = vmatprep.subr.bf16.mxu1 %v12291_v7  ;;  %v12372_v38 = vld [vmem:[#allocation51_spill] sm:$0xff] }
 0x55f   :  { %9826 = vmatprep.subr.bf16.mxu0 %v12291_v7 }
 0x560   :  { %9028 = vmatmul.mubr.f32.vlgmr.msra.gmra.mrb[24].mxu1 %v11531_v40 }
 0x561   :  { %9894 = vmatpush3.bf16.msra.mxu1 %v11292_v61  ;;  %9046 = vmatprep.mubr.msk.f32.mxu1 %vm10398_vm0, %v12296_v14  ;;  %v12373_v61 = vld [vmem:[#allocation52_spill] sm:$0xff] }
 0x562   :  { %9828 = vmatpush3.bf16.msra.mxu0 %v11298_v49  ;;  %9895 = vmatprep.subr.bf16.mxu1 %v12291_v7 }
 0x563   :  { %9829 = vmatprep.subr.bf16.mxu0 %v12291_v7 }
 0x565   :  { %9897 = vmatpush3.bf16.msra.mxu1 %v11305_v41 }
 0x566   :  { %9831 = vmatpush3.bf16.msra.mxu0 %v11313_v9  ;;  %9898 = vmatprep.subr.bf16.mxu1 %v12291_v7 }
 0x567   :  { %9832 = vmatprep.subr.bf16.mxu0 %v12291_v7 }
 0x569   :  { %8933 = vmatmul.mubr.f32.vlgmr.msra.gmra.mrb[24].mxu0 %v11534_v45  ;;  %9900 = vmatpush3.bf16.msra.mxu1 %v12364_v20  ;;  %v6394_v20 = vand.u32 4294901760, %v6369_v47 }
 0x56a   :  { %9834 = vmatpush3.bf16.msra.mxu0 %v11053_v33  ;;  %9901 = vmatprep.subr.bf16.mxu1 %v12291_v7 }
 0x56b   :  { %9835 = vmatprep.subr.bf16.mxu0 %v12291_v7  ;;  %8951 = vmatprep.mubr.msk.f32.mxu0 %vm10398_vm0, %v12296_v14 }
 0x56d   :  { %9903 = vmatpush3.bf16.msra.mxu1 %v12365_v0  ;;  %v6930_v0 = vld [vmem:[%s12206_s18 + $0x18] sm:$0xff] }
 0x56e   :  { %9837 = vmatpush3.bf16.msra.mxu0 %v11092_v58  ;;  %9904 = vmatprep.subr.bf16.mxu1 %v12291_v7 }
 0x56f   :  { %9838 = vmatprep.subr.bf16.mxu0 %v12291_v7 }
 0x570   :  { %9047 = vmatmul.mubr.f32.vlgmr.msra.gmra.mrb[24].mxu1 %v11534_v45 }
 0x571   :  { %9906 = vmatpush3.bf16.msra.mxu1 %v11119_v27  ;;  %9065 = vmatprep.mubr.msk.f32.mxu1 %vm10398_vm0, %v12296_v14 }
 0x572   :  { %9840 = vmatpush3.bf16.msra.mxu0 %v11126_v26  ;;  %9907 = vmatprep.subr.bf16.mxu1 %v12291_v7 }
 0x573   :  { %9841 = vmatprep.subr.bf16.mxu0 %v12291_v7 }
 0x575   :  { %9909 = vmatpush3.bf16.msra.mxu1 %v11141_v18 }
 0x576   :  { %9843 = vmatpush3.bf16.msra.mxu0 %v11139_v60  ;;  %9910 = vmatprep.subr.bf16.mxu1 %v12291_v7 }
 0x577   :  { %9844 = vmatprep.subr.bf16.mxu0 %v12291_v7 }
 0x579   :  { %8952 = vmatmul.mubr.f32.vlgmr.msra.gmra.mrb[24].mxu0 %v11537_v46  ;;  %9912 = vmatpush3.bf16.msra.mxu1 %v11188_v51 }
 0x57a   :  { %9846 = vmatpush3.bf16.msra.mxu0 %v12366_v37  ;;  %9913 = vmatprep.subr.bf16.mxu1 %v12291_v7  ;;  %v6949_v37 = vand.u32 4294901760, %v6929_v59 }
 0x57b   :  { %9847 = vmatprep.subr.bf16.mxu0 %v12291_v7  ;;  %8970 = vmatprep.mubr.msk.f32.mxu0 %vm10398_vm0, %v12296_v14 }
 0x57d   :  { %9915 = vmatpush3.bf16.msra.mxu1 %v11206_v32 }
 0x57e   :  { %9849 = vmatpush3.bf16.msra.mxu0 %v12367_v23  ;;  %9916 = vmatprep.subr.bf16.mxu1 %v12291_v7  ;;  %v6952_v23 = vand.u32 4294901760, %v6930_v0 }
 0x57f   :  { %9850 = vmatprep.subr.bf16.mxu0 %v12291_v7 }
 0x580   :  { %9066 = vmatmul.mubr.f32.vlgmr.msra.gmra.mrb[24].mxu1 %v11537_v46 }
 0x581   :  { %9918 = vmatpush3.bf16.msra.mxu1 %v12368_v56  ;;  %9084 = vmatprep.mubr.msk.f32.mxu1 %vm10398_vm0, %v12296_v14  ;;  %v11880_v56 = vpack.c.bf16 %v6394_v20, %v6391_v22 }
 0x582   :  { %9852 = vmatpush3.bf16.msra.mxu0 %v12369_v5  ;;  %9919 = vmatprep.subr.bf16.mxu1 %v12291_v7  ;;  %v11882_v5 = vpack.c.bf16 %v6952_v23, %v6949_v37 }
 0x583   :  { %9853 = vmatprep.subr.bf16.mxu0 %v12291_v7 }
 0x585   :  { %9921 = vmatpush3.bf16.msra.mxu1 %v12370_v39  ;;  %v6370_v39 = vld [vmem:[%s12204_s16 + $0x20] sm:$0xff] }
 0x586   :  { %9855 = vmatpush3.bf16.msra.mxu0 %v12371_v11  ;;  %9922 = vmatprep.subr.bf16.mxu1 %v12291_v7  ;;  %v6371_v11 = vld [vmem:[%s12204_s16 + $0x28] sm:$0xff] }
 0x587   :  { %9856 = vmatprep.subr.bf16.mxu0 %v12291_v7 }
 0x589   :  { %8971 = vmatmul.mubr.f32.vlgmr.msra.gmra.mrb[24].mxu0 %v11531_v40  ;;  %9924 = vmatpush3.bf16.msra.mxu1 %v12372_v38  ;;  %v6931_v38 = vld [vmem:[%s12206_s18 + $0x20] sm:$0xff] }
 0x58a   :  { %9858 = vmatpush3.bf16.msra.mxu0 %v11053_v33  ;;  %9925 = vmatprep.subr.bf16.mxu1 %v12291_v7 }
 0x58b   :  { %9859 = vmatprep.subr.bf16.mxu0 %v12291_v7  ;;  %8989 = vmatprep.mubr.msk.f32.mxu0 %vm10398_vm0, %v12296_v14 }
 0x58d   :  { %9927 = vmatpush3.bf16.msra.mxu1 %v12373_v61  ;;  %v6397_v61 = vand.u32 4294901760, %v6370_v39 }
 0x58e   :  { %9861 = vmatpush3.bf16.msra.mxu0 %v11092_v58  ;;  %9928 = vmatprep.subr.bf16.mxu1 %v12291_v7 }
 0x58f   :  { %9862 = vmatprep.subr.bf16.mxu0 %v12291_v7 }
 0x590   :  { %9085 = vmatmul.mubr.f32.vlgmr.msra.gmra.mrb[24].mxu1 %v11531_v40 }
 0x591   :  { %9930 = vmatpush3.bf16.msra.mxu1 %v11119_v27  ;;  %9103 = vmatprep.mubr.msk.f32.mxu1 %vm10398_vm0, %v12296_v14 }
 0x592   :  { %9864 = vmatpush3.bf16.msra.mxu0 %v11126_v26  ;;  %9931 = vmatprep.subr.bf16.mxu1 %v12291_v7 }
 0x593   :  { %9865 = vmatprep.subr.bf16.mxu0 %v12291_v7 }
 0x595   :  { %9933 = vmatpush3.bf16.msra.mxu1 %v11141_v18 }
 0x596   :  { %9867 = vmatpush3.bf16.msra.mxu0 %v11139_v60  ;;  %9934 = vmatprep.subr.bf16.mxu1 %v12291_v7 }
 0x597   :  { %9106 = vmatprep.subr.mxu0 %v12296_v14 }
 0x599   :  { %8990 = vmatmul.mubr.f32.vlgmr.msra.gmra.mrb[24].mxu0 %v11531_v40  ;;  %9936 = vmatpush3.bf16.msra.mxu1 %v11188_v51 }
 0x59a   :  { %9937 = vmatprep.subr.bf16.mxu1 %v12291_v7  ;;  %9108 = vmatprep.mubr.msk.f32.mxu0 %vm10398_vm0, %v12296_v14 }
 0x59d   :  { %9939 = vmatpush3.bf16.msra.mxu1 %v11206_v32 }
 0x59e   :  { %9111 = vmatprep.subr.mxu1 %v12296_v14 }
 0x5a0   :  { %9104 = vmatmul.mubr.f32.vlgmr.msra.gmra.mrb[24].mxu1 %v11531_v40  ;;  %v3851_v40 = vmul.f32 %v11659_v12, %v12374_v21  ;;  %v12379_v12 = vld [vmem:[#allocation57_spill] sm:$0xff] }
 0x5a1   :  { %9113 = vmatprep.mubr.msk.f32.mxu1 %vm10398_vm0, %v12296_v14 }
 0x603   :  { %v4464_v27 = vpop.f32.mrb[18].mxu0 }
 0x604   :  { %v8852_v33 = vpop.f32.mrb[19].mxu0 }
 0x605   :  { %v6932_v33 = vld [vmem:[%s12206_s18 + $0x28] sm:$0xff] }
 0x607   :  { %v4614_v58 = vpop.f32.mrb[20].mxu0 }
 0x608   :  { %v8862_v26 = vpop.f32.mrb[21].mxu0 }
 0x609   :  { %v6958_v26 = vand.u32 4294901760, %v6932_v33 }
 0x60b   :  { %v4540_v60 = vpop.f32.mrb[18].mxu1 }
 0x60c   :  { %v4541_v18 = vadd.f32 %v4540_v60, %v4464_v27  ;;  %v8857_v51 = vpop.f32.mrb[19].mxu1  ;;  %v4762_v49 = vpop.f32.mrb[22].mxu0  ;;  %v6400_v27 = vand.u32 4294901760, %v6371_v11  ;;  %v11899_v60 = vsub.f32 %v6366_v19, %v6385_v6 }
 0x60d   :  { %v8872_v41 = vpop.f32.mrb[23].mxu0  ;;  %v11903_v51 = vsub.f32 %v6927_v44, %v6943_v55 }
 0x60e   :  { %v4615_v9 = vadd.f32 %v4614_v58, %v4541_v18  ;;  %v6955_v58 = vand.u32 4294901760, %v6931_v38  ;;  %v11901_v18 = vsub.f32 %v6367_v34, %v6388_v17  ;;  %v11908_v41 = vsub.f32 %v6368_v1, %v6391_v22 }
 0x60f   :  { %v4688_v4 = vpop.f32.mrb[20].mxu1  ;;  %v11925_v21 = vpack.c.bf16 %v6400_v27, %v6397_v61 }
 0x610   :  { %v4689_v57 = vadd.f32 %v4688_v4, %v4615_v9  ;;  %v8867_v32 = vpop.f32.mrb[21].mxu1  ;;  %v11910_v9 = vsub.f32 %v6369_v47, %v6394_v20  ;;  %v11912_v4 = vsub.f32 %v6929_v59, %v6949_v37  ;;  %v12258_v6 = vand.u32 4294901760, %v11908_v41 }
 0x611   :  { %v6372_v32 = vld [vmem:[%s12204_s16 + $0x30] sm:$0xff] }
 0x612   :  { %v4763_v45 = vadd.f32 %v4762_v49, %v4689_v57  ;;  %v11905_v49 = vsub.f32 %v6928_v42, %v6946_v43  ;;  %v11914_v57 = vsub.f32 %v6930_v0, %v6952_v23  ;;  %v6491_v42 = vand.u32 4294901760, %v11910_v9 }
 0x613   :  { %v4834_v46 = vpop.f32.mrb[22].mxu1  ;;  %v7042_v55 = vand.u32 4294901760, %v11912_v4  ;;  %v6485_v22 = vsub.f32 %v11908_v41, %v12258_v6 }
 0x614   :  { %v4835_v24 = vadd.f32 %v4834_v46, %v4763_v45  ;;  %v8877_v62 = vpop.f32.mrb[23].mxu1  ;;  %v6373_v45 = vld [vmem:[%s12204_s16 + $0x38] sm:$0xff]  ;;  %v6933_v46 = vld [vmem:[%s12206_s18 + $0x30] sm:$0xff]  ;;  %v12259_v44 = vand.u32 4294901760, %v11905_v49  ;;  %v7049_v43 = vand.u32 4294901760, %v11914_v57  ;;  %v6492_v20 = vsub.f32 %v11910_v9, %v6491_v42  ;;  %s10401_s16 = smov [#allocation14]  }
 0x615   :  { %v11931_v62 = vpack.c.bf16 %v6958_v26, %v6955_v58  ;;  %v7043_v0 = vsub.f32 %v11912_v4, %v7042_v55 }
 0x616   :  { %v4838_v10 = vadd.f32 %v4835_v24, %v3851_v40  ;;  %v11927_v40 = vsub.f32 %v6370_v39, %v6397_v61  ;;  %v11929_v24 = vsub.f32 %v6371_v11, %v6400_v27  ;;  %v7036_v59 = vsub.f32 %v11905_v49, %v12259_v44 }
 0x617   :  { %v7050_v37 = vsub.f32 %v11914_v57, %v7049_v43  ;;  %v6493_v27 = vand.u32 4294901760, %v6492_v20 }
 0x618   :  { %v6498_v23 = vand.u32 4294901760, %v11927_v40  ;;  %v7037_v11 = vand.u32 4294901760, %v7036_v59  ;;  %v6505_v61 = vand.u32 4294901760, %v11929_v24 }
 0x66c   :  { %v5372_v15 = vpop.f32.mrb[24].mxu0 }
 0x66d   :  { %v5376_v52 = vmul.f32 %v5372_v15, %v12375_v48  ;;  %v8991_v2 = vpop.f32.mrb[25].mxu0  ;;  %v11936_v15 = vsub.f32 %v6931_v38, %v6955_v58  ;;  %v11938_v48 = vsub.f32 %v6932_v33, %v6958_v26  ;;  %v6486_v38 = vand.u32 4294901760, %v6485_v22 }
 0x66e   :  { %v6406_v2 = vand.u32 4294901760, %v6373_v45  ;;  %v7044_v33 = vand.u32 4294901760, %v7043_v0  ;;  %v7051_v58 = vand.u32 4294901760, %v7050_v37  ;;  %v6499_v26 = vsub.f32 %v11927_v40, %v6498_v23 }
 0x66f   :  { %v11821_v53 = vadd.f32 %v5376_v52, %v4838_v10  ;;  %v6934_v10 = vld [vmem:[%s12206_s18 + $0x38] sm:$0xff]  ;;  %v6403_v52 = vand.u32 4294901760, %v6372_v32  ;;  %s7496_s18 = sshll.u32 %s10401_s16, 4  ;;  %s7497_s18 = int_to_ptr.vmem [resolvable:$true] %s7496_s18 }
 0x670   :  { %s10358_s21 = scalar_lea.vmem %s7497_s18, 16  ;;  %s10362_s29 = scalar_lea.vmem %s7497_s18, 32 }
 0x671   :  { %p10359_p0 = scmp.ne.s32.totalorder %s7497_s18, %s10358_s21  ;;  %p10363_p1 = scmp.lt.s32.totalorder %s7497_s18, %s7497_s18 }
 0x672   :  { %p10364_p2 = scmp.lt.s32.totalorder %s10362_s29, %s10358_s21 }
 0x673   :  { %v5911_v16 = vpop.f32.mrb[24].mxu1 }
 0x674   :  { %v5916_v28 = vsel %vm1330_vm3, %v5911_v16, 0  ;;  %v9105_v8 = vpop.f32.mrb[25].mxu1  ;;  %v6961_v16 = vand.u32 4294901760, %v6933_v46  ;;  %p10365_p3 = por %p10364_p2, %p10363_p1 }
 0x675   :  { %v5919_v25 = vand.u32 4294901760, %v5916_v28  ;;  %v6470_v8 = vand.u32 4294901760, %v11899_v60 }
 0x676   :  { %p10366_p4 = pnand %p10365_p3, %p10359_p0 }
 0x677   :  { %v5996_v63 = vsub.f32 %v5916_v28, %v5919_v25  ;;  %9107 = vmatpush3.msra.mxu0 %v5919_v25  ;;  %v6964_v28 = vand.u32 4294901760, %v6934_v10 }
 0x678   :  { %9109 = vmatmul.mubr.f32.vlgmr.msra.gmra.mrb[26].mxu0 %v12376_v31  ;;  %9116 = vmatprep.subr.mxu0 %v12296_v14  ;;  %v11948_v31 = vsub.f32 %v6372_v32, %v6403_v52 }
 0x679   :  { %v5997_v54 = vand.u32 4294901760, %v5996_v63  ;;  %9117 = vmatpush3.msra.mxu0 %v5996_v63  ;;  %9118 = vmatprep.mubr.msk.f32.mxu0 %vm10398_vm0, %v12296_v14 }
 0x67a   :  { %9126 = vmatprep.subr.mxu0 %v12296_v14 }
 0x67b   :  { %v5998_v50 = vsub.f32 %v5996_v63, %v5997_v54  ;;  %v11946_v63 = vpack.c.bf16 %v6406_v2, %v6403_v52  ;;  %v11996_v52 = vpack.c.bf16 %v6493_v27, %v6486_v38 }
 0x67c   :  { %9119 = vmatmul.mubr.f32.vlgmr.msra.gmra.mrb[28].mxu0 %v12377_v36  ;;  %v11953_v36 = vpack.c.bf16 %v6964_v28, %v6961_v16 }
 0x67d   :  { %v5999_v30 = vand.u32 4294901760, %v5998_v50  ;;  %9127 = vmatpush3.msra.mxu0 %v5997_v54  ;;  %9128 = vmatprep.mubr.msk.f32.mxu0 %vm10398_vm0, %v12296_v14  ;;  %v11950_v54 = vsub.f32 %v6373_v45, %v6406_v2  ;;  %v12260_v50 = vand.u32 4294901760, %v11903_v51  ;;  %v6506_v45 = vsub.f32 %v11929_v24, %v6505_v61 }
 0x67e   :  { %9940 = vmatprep.subr.bf16.mxu0 %v12291_v7  ;;  %v11998_v2 = vpack.c.bf16 %v7051_v58, %v7044_v33 }
 0x67f   :  { %9112 = vmatpush3.msra.mxu1 %v5999_v30  ;;  %v11955_v30 = vsub.f32 %v6933_v46, %v6961_v16  ;;  %v7029_v34 = vsub.f32 %v11903_v51, %v12260_v50  ;;  %v7056_v46 = vand.u32 4294901760, %v11936_v15  ;;  %v6500_v16 = vand.u32 4294901760, %v6499_v26 }
 0x680   :  { %9114 = vmatmul.mubr.f32.vlgmr.msra.gmra.mrb[26].mxu1 %v12378_v3  ;;  %9121 = vmatprep.subr.mxu1 %v12296_v14  ;;  %v9965_v50 = vpack.c.bf16 %v11901_v18, %v11899_v60 }
 0x681   :  { %9122 = vmatpush3.msra.mxu1 %v5919_v25  ;;  %9123 = vmatprep.mubr.msk.f32.mxu1 %vm10398_vm0, %v12296_v14  ;;  %v7030_v47 = vand.u32 4294901760, %v7029_v34 }
 0x682   :  { %9131 = vmatprep.subr.mxu1 %v12296_v14  ;;  %9129 = vmatmul.mubr.f32.vlgmr.msra.gmra.mrb[30].mxu0 %v12378_v3 }
 0x683   :  { %9152 = vmatprep.mubr.msk.f32.mxu0 %vm10398_vm0, %v12296_v14  ;;  %9942 = vmatpush3.bf16.msra.mxu0 %v11860_v13  ;;  %v11991_v32 = vpack.c.bf16 %v7037_v11, %v7030_v47  ;;  %v7070_v47 = vand.u32 4294901760, %v11955_v30 }
 0x684   :  { %9124 = vmatmul.mubr.f32.vlgmr.msra.gmra.mrb[28].mxu1 %v12379_v12  ;;  %9943 = vmatprep.subr.bf16.mxu0 %v12291_v7  ;;  %v6471_v12 = vsub.f32 %v11899_v60, %v6470_v8 }
 0x685   :  { %9132 = vmatpush3.msra.mxu1 %v5919_v25  ;;  %9133 = vmatprep.mubr.msk.f32.mxu1 %vm10398_vm0, %v12296_v14  ;;  %v6477_v25 = vand.u32 4294901760, %v11901_v18  ;;  %v7071_v38 = vsub.f32 %v11955_v30, %v7070_v47 }
 0x686   :  { %10012 = vmatprep.subr.bf16.mxu1 %v12291_v7  ;;  %v6472_v17 = vand.u32 4294901760, %v6471_v12  ;;  %v6507_v12 = vand.u32 4294901760, %v6506_v45 }
 0x687   :  { %9945 = vmatpush3.bf16.msra.mxu0 %v11880_v56  ;;  %v6478_v19 = vsub.f32 %v11901_v18, %v6477_v25  ;;  %v7072_v26 = vand.u32 4294901760, %v7071_v38  ;;  %v12381_v38 = vand.u32 4294901760, %v11905_v49 }
 0x688   :  { %9134 = vmatmul.mubr.f32.vlgmr.msra.gmra.mrb[30].mxu1 %v12378_v3  ;;  %9946 = vmatprep.subr.bf16.mxu0 %v12291_v7  ;;  %v11957_v3 = vsub.f32 %v6934_v10, %v6964_v28  ;;  %v7063_v10 = vand.u32 4294901760, %v11938_v48  ;;  %v6512_v28 = vand.u32 4294901760, %v11948_v31  ;;  %v12007_v22 = vpack.c.bf16 %v6507_v12, %v6500_v16 }
 0x689   :  { %9266 = vmatprep.mubr.msk.f32.mxu1 %vm10398_vm0, %v12296_v14  ;;  %10014 = vmatpush3.bf16.msra.mxu1 %v11862_v29  ;;  %v6479_v1 = vand.u32 4294901760, %v6478_v19  ;;  %v7057_v19 = vsub.f32 %v11936_v15, %v7056_v46  ;;  %v10037_v16 = vpack.c.bf16 %v11905_v49, %v11903_v51  ;;  %v9968_v12 = vpack.c.bf16 %v11910_v9, %v11908_v41 }
 0x68a   :  { %10015 = vmatprep.subr.bf16.mxu1 %v12291_v7  ;;  %v7064_v34 = vsub.f32 %v11938_v48, %v7063_v10  ;;  %v7077_v59 = vand.u32 4294901760, %v11957_v3  ;;  %v12386_v9 = vpack.c.bf16 %v11957_v3, %v11955_v30 }
 0x68b   :  { %9948 = vmatpush3.bf16.msra.mxu0 %v11925_v21  ;;  %v11987_v39 = vpack.c.bf16 %v6479_v1, %v6472_v17  ;;  %v6519_v17 = vand.u32 4294901760, %v11950_v54  ;;  %v6513_v1 = vsub.f32 %v11948_v31, %v6512_v28  ;;  %v7058_v20 = vand.u32 4294901760, %v7057_v19 }
 0x68c   :  { %9949 = vmatprep.subr.bf16.mxu0 %v12291_v7  ;;  %v7065_v0 = vand.u32 4294901760, %v7064_v34  ;;  %v7078_v27 = vsub.f32 %v11957_v3, %v7077_v59  ;;  %v10040_v19 = vpack.c.bf16 %v11914_v57, %v11912_v4  ;;  %v12052_v18 = vpack.c.bf16 %v7077_v59, %v7070_v47 }
 0x68d   :  { %10017 = vmatpush3.bf16.msra.mxu1 %v11882_v5  ;;  %v6520_v37 = vsub.f32 %v11950_v54, %v6519_v17  ;;  %v6514_v11 = vand.u32 4294901760, %v6513_v1  ;;  %v12050_v60 = vpack.c.bf16 %v6519_v17, %v6512_v28 }
 0x68e   :  { %10018 = vmatprep.subr.bf16.mxu1 %v12291_v7  ;;  %v10031_v33 = vpack.c.bf16 %v7065_v0, %v7058_v20  ;;  %v7079_v45 = vand.u32 4294901760, %v7078_v27  ;;  %v12046_v20 = vpack.c.bf16 %v6505_v61, %v6498_v23  ;;  %v12048_v0 = vpack.c.bf16 %v7063_v10, %v7056_v46 }
 0x68f   :  { %9951 = vmatpush3.bf16.msra.mxu0 %v11946_v63  ;;  %v6521_v58 = vand.u32 4294901760, %v6520_v37  ;;  %v12032_v37 = vpack.c.bf16 %v6477_v25, %v6470_v8 }
 0x690   :  { %9952 = vmatprep.subr.bf16.mxu0 %v12291_v7  ;;  %v10034_v44 = vpack.c.bf16 %v7079_v45, %v7072_v26  ;;  %v12044_v45 = vpack.c.bf16 %v7049_v43, %v7042_v55 }
 0x691   :  { %10020 = vmatpush3.bf16.msra.mxu1 %v11931_v62  ;;  %v9962_v6 = vpack.c.bf16 %v6521_v58, %v6514_v11  ;;  %v12380_v11 = vand.u32 4294901760, %v11903_v51  ;;  %v12382_v58 = vand.u32 4294901760, %v11908_v41  ;;  %v12385_v41 = vpack.c.bf16 %v11950_v54, %v11948_v31 }
 0x692   :  { %10021 = vmatprep.subr.bf16.mxu1 %v12291_v7 }
 0x693   :  { %v12038_v27 = vpack.c.bf16 %v12381_v38, %v12380_v11  ;;  %v12042_v26 = vpack.c.bf16 %v6491_v42, %v12382_v58 }
 0x695   :  { %10023 = vmatpush3.bf16.msra.mxu1 %v11953_v36 }
 0x696   :  { %10024 = vmatprep.subr.bf16.mxu1 %v12291_v7 }
 0x74b   :  { %v5990_v8 = vpop.f32.mrb[26].mxu0 }
 0x74c   :  { %v9110_v51 = vpop.f32.mrb[27].mxu0 }
 0x74f   :  { %v6140_v25 = vpop.f32.mrb[28].mxu0 }
 0x750   :  { %v9120_v49 = vpop.f32.mrb[29].mxu0 }
 0x753   :  { %v6066_v11 = vpop.f32.mrb[26].mxu1 }
 0x754   :  { %v6067_v38 = vadd.f32 %v6066_v11, %v5990_v8  ;;  %v9115_v1 = vpop.f32.mrb[27].mxu1 }
 0x755   :  { %v6288_v34 = vpop.f32.mrb[30].mxu0 }
 0x756   :  { %v6141_v42 = vadd.f32 %v6140_v25, %v6067_v38  ;;  %v9130_v58 = vpop.f32.mrb[31].mxu0 }
 0x757   :  { %v6214_v55 = vpop.f32.mrb[28].mxu1 }
 0x758   :  { %v6215_v43 = vadd.f32 %v6214_v55, %v6141_v42  ;;  %v9125_v23 = vpop.f32.mrb[29].mxu1 }
 0x75a   :  { %v6289_v61 = vadd.f32 %v6288_v34, %v6215_v43 }
 0x75b   :  { %v6360_v46 = vpop.f32.mrb[30].mxu1 }
 0x75c   :  { %v6361_v10 = vadd.f32 %v6360_v46, %v6289_v61  ;;  %v9135_v28 = vpop.f32.mrb[31].mxu1 }
 0x75e   :  { %v6364_v17 = vadd.f32 %v6361_v10, %v11821_v53  ;;  %v12384_v53 = vpack.c.bf16 %v11938_v48, %v11936_v15 }
 0x760   :  { %v6365_v47 = vadd.f32 %v6364_v17, %v11526_v35  ;;  %v12383_v35 = vpack.c.bf16 %v11929_v24, %v11927_v40 }
 0x762   :  { %v6382_v59 = vsel %vm247_vm1, %v6365_v47, 0 }
 0x763   :  { %v12057_v51 = vand.u32 4294901760, %v6382_v59 }
 0x765   :  { %v6458_v1 = vsub.f32 %v6382_v59, %v12057_v51 }
 0x767   :  { %v12060_v8 = vand.u32 4294901760, %v6458_v1 }
 0x769   :  { %v6460_v25 = vsub.f32 %v6458_v1, %v12060_v8 }
 0x76b   :  { %v6461_v49 = vand.u32 4294901760, %v6460_v25 }
 0x76d   :  { %9153 = vmatmul.mubr.f32.vlgmr.msra.gmra.mrb[32].mxu0 %v6461_v49  ;;  %9267 = vmatmul.mubr.f32.vlgmr.msra.gmra.mrb[32].mxu1 %v6461_v49 }
 0x76e   :  { %9954 = vmatpush3.bf16.msra.mxu0 %v11987_v39  ;;  %10026 = vmatpush3.bf16.msra.mxu1 %v11991_v32 }
 0x76f   :  { %9955 = vmatprep.subr.bf16.mxu0 %v12291_v7  ;;  %10027 = vmatprep.subr.bf16.mxu1 %v12291_v7 }
 0x770   :  { %9171 = vmatprep.mubr.msk.f32.mxu0 %vm10398_vm0, %v12296_v14  ;;  %9285 = vmatprep.mubr.msk.f32.mxu1 %vm10398_vm0, %v12296_v14 }
 0x772   :  { %9957 = vmatpush3.bf16.msra.mxu0 %v11996_v52  ;;  %10029 = vmatpush3.bf16.msra.mxu1 %v11998_v2 }
 0x773   :  { %9958 = vmatprep.subr.bf16.mxu0 %v12291_v7  ;;  %10030 = vmatprep.subr.bf16.mxu1 %v12291_v7 }
 0x776   :  { %9960 = vmatpush3.bf16.msra.mxu0 %v12007_v22  ;;  %10032 = vmatpush3.bf16.msra.mxu1 %v10031_v33 }
 0x777   :  { %9961 = vmatprep.subr.bf16.mxu0 %v12291_v7  ;;  %10033 = vmatprep.subr.bf16.mxu1 %v12291_v7 }
 0x77a   :  { %9963 = vmatpush3.bf16.msra.mxu0 %v9962_v6  ;;  %10035 = vmatpush3.bf16.msra.mxu1 %v10034_v44 }
 0x77b   :  { %9964 = vmatprep.subr.bf16.mxu0 %v12291_v7  ;;  %10036 = vmatprep.subr.bf16.mxu1 %v12291_v7 }
 0x77d   :  { %9172 = vmatmul.mubr.f32.vlgmr.msra.gmra.mrb[32].mxu0 %v12057_v51  ;;  %9286 = vmatmul.mubr.f32.vlgmr.msra.gmra.mrb[32].mxu1 %v12057_v51 }
 0x77e   :  { %9966 = vmatpush3.bf16.msra.mxu0 %v9965_v50  ;;  %10038 = vmatpush3.bf16.msra.mxu1 %v10037_v16 }
 0x77f   :  { %9967 = vmatprep.subr.bf16.mxu0 %v12291_v7  ;;  %10039 = vmatprep.subr.bf16.mxu1 %v12291_v7 }
 0x780   :  { %9190 = vmatprep.mubr.msk.f32.mxu0 %vm10398_vm0, %v12296_v14  ;;  %9304 = vmatprep.mubr.msk.f32.mxu1 %vm10398_vm0, %v12296_v14 }
 0x782   :  { %9969 = vmatpush3.bf16.msra.mxu0 %v9968_v12  ;;  %10041 = vmatpush3.bf16.msra.mxu1 %v10040_v19 }
 0x783   :  { %9970 = vmatprep.subr.bf16.mxu0 %v12291_v7  ;;  %10042 = vmatprep.subr.bf16.mxu1 %v12291_v7 }
 0x786   :  { %9972 = vmatpush3.bf16.msra.mxu0 %v12383_v35  ;;  %10044 = vmatpush3.bf16.msra.mxu1 %v12384_v53 }
 0x787   :  { %9973 = vmatprep.subr.bf16.mxu0 %v12291_v7  ;;  %10045 = vmatprep.subr.bf16.mxu1 %v12291_v7 }
 0x78a   :  { %9975 = vmatpush3.bf16.msra.mxu0 %v12385_v41  ;;  %10047 = vmatpush3.bf16.msra.mxu1 %v12386_v9 }
 0x78b   :  { %9976 = vmatprep.subr.bf16.mxu0 %v12291_v7  ;;  %10048 = vmatprep.subr.bf16.mxu1 %v12291_v7 }
 0x78d   :  { %9191 = vmatmul.mubr.f32.vlgmr.msra.gmra.mrb[32].mxu0 %v6458_v1  ;;  %9305 = vmatmul.mubr.f32.vlgmr.msra.gmra.mrb[32].mxu1 %v6458_v1 }
 0x78e   :  { %9978 = vmatpush3.bf16.msra.mxu0 %v11860_v13  ;;  %10050 = vmatpush3.bf16.msra.mxu1 %v11862_v29 }
 0x78f   :  { %9979 = vmatprep.subr.bf16.mxu0 %v12291_v7  ;;  %10051 = vmatprep.subr.bf16.mxu1 %v12291_v7 }
 0x790   :  { %9209 = vmatprep.mubr.msk.f32.mxu0 %vm10398_vm0, %v12296_v14  ;;  %9323 = vmatprep.mubr.msk.f32.mxu1 %vm10398_vm0, %v12296_v14 }
 0x792   :  { %9981 = vmatpush3.bf16.msra.mxu0 %v11880_v56  ;;  %10053 = vmatpush3.bf16.msra.mxu1 %v11882_v5 }
 0x793   :  { %9982 = vmatprep.subr.bf16.mxu0 %v12291_v7  ;;  %10054 = vmatprep.subr.bf16.mxu1 %v12291_v7 }
 0x796   :  { %9984 = vmatpush3.bf16.msra.mxu0 %v11925_v21  ;;  %10056 = vmatpush3.bf16.msra.mxu1 %v11931_v62 }
 0x797   :  { %9985 = vmatprep.subr.bf16.mxu0 %v12291_v7  ;;  %10057 = vmatprep.subr.bf16.mxu1 %v12291_v7 }
 0x79a   :  { %9987 = vmatpush3.bf16.msra.mxu0 %v11946_v63  ;;  %10059 = vmatpush3.bf16.msra.mxu1 %v11953_v36 }
 0x79b   :  { %9988 = vmatprep.subr.bf16.mxu0 %v12291_v7  ;;  %10060 = vmatprep.subr.bf16.mxu1 %v12291_v7 }
 0x79d   :  { %9210 = vmatmul.mubr.f32.vlgmr.msra.gmra.mrb[32].mxu0 %v12060_v8  ;;  %9324 = vmatmul.mubr.f32.vlgmr.msra.gmra.mrb[32].mxu1 %v12060_v8 }
 0x79e   :  { %9990 = vmatpush3.bf16.msra.mxu0 %v12032_v37  ;;  %10062 = vmatpush3.bf16.msra.mxu1 %v12038_v27 }
 0x79f   :  { %9991 = vmatprep.subr.bf16.mxu0 %v12291_v7  ;;  %10063 = vmatprep.subr.bf16.mxu1 %v12291_v7 }
 0x7a0   :  { %9228 = vmatprep.mubr.msk.f32.mxu0 %vm10398_vm0, %v12296_v14  ;;  %9342 = vmatprep.mubr.msk.f32.mxu1 %vm10398_vm0, %v12296_v14 }
 0x7a2   :  { %9993 = vmatpush3.bf16.msra.mxu0 %v12042_v26  ;;  %10065 = vmatpush3.bf16.msra.mxu1 %v12044_v45 }
 0x7a3   :  { %9994 = vmatprep.subr.bf16.mxu0 %v12291_v7  ;;  %10066 = vmatprep.subr.bf16.mxu1 %v12291_v7 }
 0x7a6   :  { %9996 = vmatpush3.bf16.msra.mxu0 %v12046_v20  ;;  %10068 = vmatpush3.bf16.msra.mxu1 %v12048_v0 }
 0x7a7   :  { %9997 = vmatprep.subr.bf16.mxu0 %v12291_v7  ;;  %10069 = vmatprep.subr.bf16.mxu1 %v12291_v7 }
 0x7aa   :  { %9999 = vmatpush3.bf16.msra.mxu0 %v12050_v60  ;;  %10071 = vmatpush3.bf16.msra.mxu1 %v12052_v18 }
 0x7ab   :  { %10000 = vmatprep.subr.bf16.mxu0 %v12291_v7  ;;  %10072 = vmatprep.subr.bf16.mxu1 %v12291_v7 }
 0x7ad   :  { %9229 = vmatmul.mubr.f32.vlgmr.msra.gmra.mrb[32].mxu0 %v12057_v51  ;;  %9343 = vmatmul.mubr.f32.vlgmr.msra.gmra.mrb[32].mxu1 %v12057_v51 }
 0x7ae   :  { %10002 = vmatpush3.bf16.msra.mxu0 %v11860_v13  ;;  %10074 = vmatpush3.bf16.msra.mxu1 %v11862_v29 }
 0x7af   :  { %10003 = vmatprep.subr.bf16.mxu0 %v12291_v7  ;;  %10075 = vmatprep.subr.bf16.mxu1 %v12291_v7 }
 0x7b0   :  { %9247 = vmatprep.mubr.msk.f32.mxu0 %vm10398_vm0, %v12296_v14  ;;  %9361 = vmatprep.mubr.msk.f32.mxu1 %vm10398_vm0, %v12296_v14  ;;  %v7513_v14 = vld [vmem:[#allocation11] ss:$0 sm:$0xff] }
 0x7b2   :  { %10005 = vmatpush3.bf16.msra.mxu0 %v11880_v56  ;;  %10077 = vmatpush3.bf16.msra.mxu1 %v11882_v5 }
 0x7b3   :  { %10006 = vmatprep.subr.bf16.mxu0 %v12291_v7  ;;  %10078 = vmatprep.subr.bf16.mxu1 %v12291_v7 }
 0x7b6   :  { %10008 = vmatpush3.bf16.msra.mxu0 %v11925_v21  ;;  %10080 = vmatpush3.bf16.msra.mxu1 %v11931_v62 }
 0x7b7   :  { %10009 = vmatprep.subr.bf16.mxu0 %v12291_v7  ;;  %10081 = vmatprep.subr.bf16.mxu1 %v12291_v7  ;;  %v7515_v7 = vld [vmem:[#allocation13] ss:$0 sm:$0xff] }
 0x7ba   :  { %10011 = vmatpush3.bf16.msra.mxu0 %v11946_v63  ;;  %10083 = vmatpush3.bf16.msra.mxu1 %v11953_v36 }
 0x7bd   :  { %9248 = vmatmul.mubr.f32.vlgmr.msra.gmra.mrb[32].mxu0 %v12057_v51  ;;  %9362 = vmatmul.mubr.f32.vlgmr.msra.gmra.mrb[32].mxu1 %v12057_v51 }
 0x890   :  { %v6917_v13 = vpop.f32.mrb[32].mxu0  ;;  %v7475_v29 = vpop.f32.mrb[32].mxu1 }
 0x891   :  { %v10084_v56 = vadd.f32 %v7513_v14, %v6917_v13  ;;  %v9249_v5 = vpop.f32.mrb[33].mxu0  ;;  %v9363_v4 = vpop.f32.mrb[33].mxu1  ;;  %v10085_v24 = vadd.f32 %v7515_v7, %v7475_v29 }
 0x893   :  { %v7514_v57 = vmul.f32 -1.442695, %v10084_v56 }
 0x895   :  { %10200 = vpow2.f32 %v7514_v57 }
 0x89f   :  { %v10201_v21 = vpop.eup %10200 }
 0x8a0   :  { %v6924_v40 = vadd.f32 1.0, %v10201_v21 }
 0x8a2   :  { %10202 = vrcp.f32 %v6924_v40 }
 0x8ac   :  { %v10203_v62 = vpop.eup %10202 }
 0x8ad   :  { %v7479_v15 = vmul.f32 %v10203_v62, %v10085_v24 }
 0x8af   :  { %v7481_v48 = vsel %vm7480_vm5, %v7479_v15, 0.0 }
 0x8b0   :  { %v7482_v63 = vrot.slane %v7481_v48, 4 }
 0x8b2   :  { %v7483_v31 = vadd.f32 %v7482_v63, %v7481_v48 }
 0x8b4   :  { %v7484_v54 = vrot.slane %v7483_v31, 2 }
 0x8b6   :  { %v7485_v50 = vadd.f32 %v7484_v54, %v7483_v31 }
 0x8b8   :  { %v7486_v36 = vrot.slane %v7485_v50, 1 }
 0x8ba   :  { %v7487_v30 = vadd.f32 %v7486_v36, %v7485_v50 }
 0x8bc   :  { %7489 = vst.msk [vmem:[#allocation14] sm:$0x1] %vm7488_vm6, %v7487_v30 }
 0x8bd   :  { %10369 = shalt.err (!%p10366_p4)
}
 0x8be   :  { %s10370_s3 = scalar_lea.hbm %s12208_s20, 16 }
 0x8bf   :  { %p10371_p5 = scmp.ne.s32.totalorder %s12208_s20, %s10370_s3  ;;  %p10374_p6 = scmp.lt.u32.totalorder %s10370_s3, %s12208_s20 }
 0x8c1   :  { %p10376_p7 = pnand %p10374_p6, %p10371_p5 }
 0x8c3   :  { %10379 = shalt.err (!%p10376_p7)
}
 0x8c4   :  { %7499 = dma.vmem_to_hbm [thread:$0]  %s7497_s18, 16, %s12208_s20, [#allocation4]  }
 0x8c5   :  { %10388 = dma.done.wait [#allocation4], 16  }
 0x8c6   :  { %10389 = vsyncadd [#allocation4], 4294967280 }
 0x8c7   :  { %7503 = vsyncpa [#allocation3], 1 }
 0x8c8   :  { %7504 = vsyncpa [#allocation6], 1 }
 0x8c9   :  { %7505 = vsyncpa [#allocation9], 1 }
 0x8ca   :  { %7506 = vsyncpa [#allocation12], 1 }
 0x8cb   :  { %7507 = vsyncpa [#allocation4], 1 }

</bundles_post_ra>
